<compile_context>
chip_gen: v7x
topology: tpu7x:2x2x1
jax: 0.10.0
libtpu: 0.0.40
codegen_flags: <defaults>
</compile_context>

<pallas_src>
import functools

import jax
import jax.numpy as jnp
from jax.experimental import pallas as pl
from jax.experimental.pallas import tpu as pltpu


# ----------------------------- kernel factory ---------------------------------
def _make_kernel(*, k, s, nb, th, th_in, wo, act):
    """Fused conv(k x k, stride s) + BN bias + SiLU for a (nb, th, wo, tn) output tile.

    Refs (in order):
      th_in x row_ref : (nb, 1, Wp, C1)   bf16   padded input row (h*th*s + r)
      w_ref           : (k*k*C1, TN)      bf16   BN-scale-folded conv weight
      b_ref           : (1, TN)           f32    BN bias (beta - mean * scale)
      o_ref           : (nb, th, wo, TN)         output tile
    """
    span = (wo - 1) * s + 1  # padded-input width needed for one output row

    def kernel(*refs):
        row_refs = refs[:th_in]
        w_ref = refs[th_in]
        b_ref = refs[th_in + 1]
        o_ref = refs[th_in + 2]
        tn = o_ref.shape[-1]
        kk_c1 = w_ref.shape[0]

        # Assemble the (nb, th_in, Wp, C1) input slab from the single-row tiles.
        x = jnp.concatenate([row_refs[r][...] for r in range(th_in)], axis=1)

        # Patch matrix: one (nb, th, wo, C1) slice per (dy, dx) tap, concatenated along
        # the contraction axis -> (nb, th, wo, k*k*C1). These copies run on ld/st/XLU
        # slots and overlap with the MXU.
        cols = []
        for dy in range(k):
            xr = x[:, dy:dy + (th - 1) * s + 1:s, :, :]          # (nb, th, Wp, C1)
            for dx in range(k):
                cols.append(xr[:, :, dx:dx + span:s, :])         # (nb, th, wo, C1)
        patches = jnp.concatenate(cols, axis=-1)                 # (nb, th, wo, k*k*C1)
        lhs = patches.reshape(nb * th * wo, kk_c1)

        # Single fused matmul: M = nb*th*wo, K = k*k*C1, N = tn; f32 accumulation on MXU.
        acc = jnp.dot(lhs, w_ref[...], preferred_element_type=jnp.float32)
        y = acc + b_ref[...]                                     # folded BN bias
        if act:
            y = y * jax.nn.sigmoid(y)                            # SiLU (EUP)
        o_ref[...] = y.reshape(nb, th, wo, tn).astype(o_ref.dtype)

    return kernel


# ----------------------------- tiling helpers ----------------------------------
def _pick_c2_tile(c2p, cap=512):
    """Largest multiple-of-128 tile <= cap that divides the padded channel count."""
    best = 128
    t = 128
    while t <= min(cap, c2p):
        if c2p % t == 0:
            best = t
        t += 128
    return best


def _pick_th(ho, wo, k, s, max_row_specs=20):
    """Output rows per step: target th*wo >= 128, bounded operand count."""
    th = max(1, -(-128 // wo))           # ceil(128 / wo)
    th = min(th, ho, 16)
    while th > 1 and (th - 1) * s + k > max_row_specs:
        th -= 1
    return th


def _pick_nb(n, per_nb_bytes, th, wo, budget, m_cap=2048):
    """Largest divisor of the batch size whose per-step working set fits the budget."""
    nb = 1
    for cand in range(1, n + 1):
        if n % cand:
            continue
        if cand * th * wo <= m_cap and cand * per_nb_bytes <= budget:
            nb = cand
    return nb


def _vmem_cap_bytes():
    """Per-generation vmem_limit ceiling (v5e/v6e have 128 MiB physical; v7x only 64)."""
    try:
        kind = jax.devices()[0].device_kind.lower()
    except Exception:
        kind = ""
    if "v5" in kind or "v6" in kind:
        return 100 << 20
    return 48 << 20


# ----------------------------- pallas_call wrapper ------------------------------
def _conv_bn_silu_pallas(xp, w2d, b, *, k, s, nb, th, ho_pad, wo, tn, act, out_dtype):
    N, Hp, Wp, C1 = xp.shape
    kk_c1, C2p = w2d.shape
    th_in = (th - 1) * s + k
    assert N % nb == 0 and ho_pad % th == 0 and C2p % tn == 0

    # h fastest -> weight/bias block indices constant across the inner sweep (no re-DMA).
    grid = (C2p // tn, N // nb, ho_pad // th)

    # One input spec per needed padded row r of the h-block's window (block size 1 on H,
    # so the blocked index equals the element offset h*th*s + r).
    x_specs = [
        pl.BlockSpec((nb, 1, Wp, C1),
                     lambda j, bn, h, r=r: (bn, h * th * s + r, 0, 0))
        for r in range(th_in)
    ]
    w_spec = pl.BlockSpec((kk_c1, tn), lambda j, bn, h: (0, j))
    b_spec = pl.BlockSpec((1, tn), lambda j, bn, h: (0, j))
    o_spec = pl.BlockSpec((nb, th, wo, tn), lambda j, bn, h: (bn, h, 0, j))

    kernel = _make_kernel(k=k, s=s, nb=nb, th=th, th_in=th_in, wo=wo, act=act)

    out_it = jnp.dtype(out_dtype).itemsize
    m = nb * th * wo
    est = (2 * (th_in * nb * Wp * C1 * 2          # double-buffered input rows
                + kk_c1 * tn * 2                  # weight tile
                + tn * 4                          # bias tile
                + m * tn * out_it)                # output tile
           + m * (kk_c1 * 2 + tn * 4 + tn * out_it)   # patches / f32 acc / cast temps
           + nb * th_in * Wp * C1 * 2)            # concatenated input slab
    vmem_limit = int(min(_vmem_cap_bytes(), max(32 << 20, 2 * est + (8 << 20))))

    return pl.pallas_call(
        kernel,
        out_shape=jax.ShapeDtypeStruct((N, ho_pad, wo, C2p), out_dtype),
        grid_spec=pltpu.PrefetchScalarGridSpec(
            num_scalar_prefetch=0,
            grid=grid,
            in_specs=x_specs + [w_spec, b_spec],
            out_specs=o_spec,
        ),
        compiler_params=pltpu.CompilerParams(
            dimension_semantics=("parallel", "parallel", "parallel"),
            vmem_limit_bytes=vmem_limit,
        ),
    )(*([xp] * th_in), w2d, b)


# ------------------------------- forward ---------------------------------------
def conv_forward(x_nchw, weight, gamma, beta, running_mean, running_var,
                 *, k=1, p=0, s=1, eps=1e-5, act=True):
    """Equivalent of Conv(c1, c2, k, p, s, act, depthwise=False).forward in eval mode.

    x_nchw: (N, C1, H, W) f32; weight: (C2, C1, k, k) as in PyTorch Conv2d (bias=False).
    """
    N, C1, H, W = x_nchw.shape
    C2 = weight.shape[0]
    Ho = (H + 2 * p - k) // s + 1
    Wo = (W + 2 * p - k) // s + 1
    C2p = ((C2 + 127) // 128) * 128          # lane-dense output channels

    # Fold BatchNorm (inference) into the conv: scale -> weight, bias kept for epilogue.
    inv_std = gamma / jnp.sqrt(running_var + eps)                 # (C2,)
    w = jnp.transpose(weight, (2, 3, 1, 0)) * inv_std             # (k, k, C1, C2)
    w = jnp.pad(w, ((0, 0), (0, 0), (0, 0), (0, C2p - C2)))
    w2d = w.reshape(k * k * C1, C2p).astype(jnp.bfloat16)         # K order = (dy, dx, c)
    b = jnp.pad(beta - running_mean * inv_std, (0, C2p - C2))
    b = b.reshape(1, C2p).astype(jnp.float32)

    # Tile selection.
    tn = _pick_c2_tile(C2p)
    th = _pick_th(Ho, Wo, k, s)
    ho_pad = -(-Ho // th) * th
    th_in = (th - 1) * s + k
    Wp = W + 2 * p
    out_dtype = x_nchw.dtype
    out_it = jnp.dtype(out_dtype).itemsize
    per_nb = (2 * (th_in * Wp * C1 * 2 + th * Wo * tn * out_it)
              + th * Wo * (k * k * C1 * 2 + tn * 4) + th_in * Wp * C1 * 2)
    nb = _pick_nb(N, per_nb, th, Wo, budget=24 << 20)

    # NCHW -> NHWC, spatial zero-pad; extra bottom rows so every h-block's input window
    # [(h*th)*s, (h*th)*s + th_in) stays in range for the padded-up Ho.
    x = jnp.transpose(x_nchw, (0, 2, 3, 1))                       # (N, H, W, C1)
    hp_needed = (ho_pad - 1) * s + k
    pad_bottom = p + max(0, hp_needed - (H + 2 * p))
    xp = jnp.pad(x, ((0, 0), (p, pad_bottom), (p, p), (0, 0))).astype(jnp.bfloat16)

    out = _conv_bn_silu_pallas(xp, w2d, b, k=k, s=s, nb=nb, th=th,
                               ho_pad=ho_pad, wo=Wo, tn=tn, act=act,
                               out_dtype=out_dtype)

    out = out[:, :Ho, :, :C2]                                     # drop row/channel padding
    return jnp.transpose(out, (0, 3, 1, 2))                       # back to NCHW


# -------------------------------- main ------------------------------------------
if __name__ == "__main__":
    # Conv(c1=4, c2=32, k=3, p=1, s=1, act=True, depthwise=False)
    N, C1, H, W = 2, 4, 16, 16
    C2, K, P, S = 32, 3, 1, 1

    key = jax.random.PRNGKey(0)
    kx, kw, kg, kb, km, kv = jax.random.split(key, 6)

    x = jax.random.normal(kx, (N, C1, H, W), dtype=jnp.float32)
    weight = jax.random.normal(kw, (C2, C1, K, K), dtype=jnp.float32) * 0.1
    gamma = jax.random.normal(kg, (C2,), dtype=jnp.float32) * 0.1 + 1.0
    beta = jax.random.normal(kb, (C2,), dtype=jnp.float32) * 0.1
    running_mean = jax.random.normal(km, (C2,), dtype=jnp.float32) * 0.1
    running_var = jnp.abs(jax.random.normal(kv, (C2,), dtype=jnp.float32)) * 0.1 + 1.0

    fwd = jax.jit(functools.partial(conv_forward, k=K, p=P, s=S))
    out = jax.block_until_ready(fwd(x, weight, gamma, beta, running_mean, running_var))

    # f32 reference; kernel uses bf16 operands with f32 accumulation -> loosened tolerance.
    ref_conv = jax.lax.conv_general_dilated(
        x, weight, window_strides=(S, S), padding=[(P, P), (P, P)],
        dimension_numbers=("NCHW", "OIHW", "NCHW"))
    sc = (gamma / jnp.sqrt(running_var + 1e-5)).reshape(1, C2, 1, 1)
    bi = (beta - running_mean * gamma / jnp.sqrt(running_var + 1e-5)).reshape(1, C2, 1, 1)
    ref = ref_conv * sc + bi
    ref = ref * jax.nn.sigmoid(ref)

    assert out.shape == (N, C2, H, W)
    max_err = float(jnp.max(jnp.abs(out - ref)))
    assert jnp.allclose(out, ref, atol=3e-2, rtol=3e-2), f"max_err={max_err}"

    print("KERNEL_OK")
</pallas_src>

<mosaic_0001>
module attributes {stable_mosaic.version = 11 : i64} {
  func.func @kernel(%arg0: i32, %arg1: i32, %arg2: i32, %arg3: memref<2x1x18x4xbf16, #tpu.memory_space<vmem>>, %arg4: memref<2x1x18x4xbf16, #tpu.memory_space<vmem>>, %arg5: memref<2x1x18x4xbf16, #tpu.memory_space<vmem>>, %arg6: memref<2x1x18x4xbf16, #tpu.memory_space<vmem>>, %arg7: memref<2x1x18x4xbf16, #tpu.memory_space<vmem>>, %arg8: memref<2x1x18x4xbf16, #tpu.memory_space<vmem>>, %arg9: memref<2x1x18x4xbf16, #tpu.memory_space<vmem>>, %arg10: memref<2x1x18x4xbf16, #tpu.memory_space<vmem>>, %arg11: memref<2x1x18x4xbf16, #tpu.memory_space<vmem>>, %arg12: memref<2x1x18x4xbf16, #tpu.memory_space<vmem>>, %arg13: memref<36x128xbf16, #tpu.memory_space<vmem>>, %arg14: memref<1x128xf32, #tpu.memory_space<vmem>>, %arg15: memref<2x8x16x128xf32, #tpu.memory_space<vmem>>) attributes {dimension_semantics = [#tpu.dimension_semantics<parallel>, #tpu.dimension_semantics<parallel>, #tpu.dimension_semantics<parallel>], iteration_bounds = array<i64: 1, 1, 2>, scalar_prefetch = 0 : i64, scratch_operands = 0 : i64, tpu.core_type = #tpu.core_type<tc>, window_params = [{transform_indices = @transform_0, window_bounds = array<i64: 2, 1, 18, 4>}, {transform_indices = @transform_1, window_bounds = array<i64: 2, 1, 18, 4>}, {transform_indices = @transform_2, window_bounds = array<i64: 2, 1, 18, 4>}, {transform_indices = @transform_3, window_bounds = array<i64: 2, 1, 18, 4>}, {transform_indices = @transform_4, window_bounds = array<i64: 2, 1, 18, 4>}, {transform_indices = @transform_5, window_bounds = array<i64: 2, 1, 18, 4>}, {transform_indices = @transform_6, window_bounds = array<i64: 2, 1, 18, 4>}, {transform_indices = @transform_7, window_bounds = array<i64: 2, 1, 18, 4>}, {transform_indices = @transform_8, window_bounds = array<i64: 2, 1, 18, 4>}, {transform_indices = @transform_9, window_bounds = array<i64: 2, 1, 18, 4>}, {transform_indices = @transform_10, window_bounds = array<i64: 36, 128>}, {transform_indices = @transform_11, window_bounds = array<i64: 1, 128>}, {transform_indices = @transform_12, window_bounds = array<i64: 2, 8, 16, 128>}]} {
    %c0 = arith.constant 0 : index
    %c0_0 = arith.constant 0 : index
    %c0_1 = arith.constant 0 : index
    %c0_2 = arith.constant 0 : index
    %0 = vector.load %arg3[%c0, %c0_0, %c0_1, %c0_2] : memref<2x1x18x4xbf16, #tpu.memory_space<vmem>>, vector<2x1x18x4xbf16>
    %c0_3 = arith.constant 0 : index
    %c0_4 = arith.constant 0 : index
    %c0_5 = arith.constant 0 : index
    %c0_6 = arith.constant 0 : index
    %1 = vector.load %arg4[%c0_3, %c0_4, %c0_5, %c0_6] : memref<2x1x18x4xbf16, #tpu.memory_space<vmem>>, vector<2x1x18x4xbf16>
    %c0_7 = arith.constant 0 : index
    %c0_8 = arith.constant 0 : index
    %c0_9 = arith.constant 0 : index
    %c0_10 = arith.constant 0 : index
    %2 = vector.load %arg5[%c0_7, %c0_8, %c0_9, %c0_10] : memref<2x1x18x4xbf16, #tpu.memory_space<vmem>>, vector<2x1x18x4xbf16>
    %c0_11 = arith.constant 0 : index
    %c0_12 = arith.constant 0 : index
    %c0_13 = arith.constant 0 : index
    %c0_14 = arith.constant 0 : index
    %3 = vector.load %arg6[%c0_11, %c0_12, %c0_13, %c0_14] : memref<2x1x18x4xbf16, #tpu.memory_space<vmem>>, vector<2x1x18x4xbf16>
    %c0_15 = arith.constant 0 : index
    %c0_16 = arith.constant 0 : index
    %c0_17 = arith.constant 0 : index
    %c0_18 = arith.constant 0 : index
    %4 = vector.load %arg7[%c0_15, %c0_16, %c0_17, %c0_18] : memref<2x1x18x4xbf16, #tpu.memory_space<vmem>>, vector<2x1x18x4xbf16>
    %c0_19 = arith.constant 0 : index
    %c0_20 = arith.constant 0 : index
    %c0_21 = arith.constant 0 : index
    %c0_22 = arith.constant 0 : index
    %5 = vector.load %arg8[%c0_19, %c0_20, %c0_21, %c0_22] : memref<2x1x18x4xbf16, #tpu.memory_space<vmem>>, vector<2x1x18x4xbf16>
    %c0_23 = arith.constant 0 : index
    %c0_24 = arith.constant 0 : index
    %c0_25 = arith.constant 0 : index
    %c0_26 = arith.constant 0 : index
    %6 = vector.load %arg9[%c0_23, %c0_24, %c0_25, %c0_26] : memref<2x1x18x4xbf16, #tpu.memory_space<vmem>>, vector<2x1x18x4xbf16>
    %c0_27 = arith.constant 0 : index
    %c0_28 = arith.constant 0 : index
    %c0_29 = arith.constant 0 : index
    %c0_30 = arith.constant 0 : index
    %7 = vector.load %arg10[%c0_27, %c0_28, %c0_29, %c0_30] : memref<2x1x18x4xbf16, #tpu.memory_space<vmem>>, vector<2x1x18x4xbf16>
    %c0_31 = arith.constant 0 : index
    %c0_32 = arith.constant 0 : index
    %c0_33 = arith.constant 0 : index
    %c0_34 = arith.constant 0 : index
    %8 = vector.load %arg11[%c0_31, %c0_32, %c0_33, %c0_34] : memref<2x1x18x4xbf16, #tpu.memory_space<vmem>>, vector<2x1x18x4xbf16>
    %c0_35 = arith.constant 0 : index
    %c0_36 = arith.constant 0 : index
    %c0_37 = arith.constant 0 : index
    %c0_38 = arith.constant 0 : index
    %9 = vector.load %arg12[%c0_35, %c0_36, %c0_37, %c0_38] : memref<2x1x18x4xbf16, #tpu.memory_space<vmem>>, vector<2x1x18x4xbf16>
    %10 = tpu.concatenate %0, %1, %2, %3, %4, %5, %6, %7, %8, %9 in 1 : vector<2x1x18x4xbf16>, vector<2x1x18x4xbf16>, vector<2x1x18x4xbf16>, vector<2x1x18x4xbf16>, vector<2x1x18x4xbf16>, vector<2x1x18x4xbf16>, vector<2x1x18x4xbf16>, vector<2x1x18x4xbf16>, vector<2x1x18x4xbf16>, vector<2x1x18x4xbf16> -> vector<2x10x18x4xbf16>
    %11 = vector.extract_strided_slice %10 {offsets = [0, 0, 0, 0], sizes = [2, 8, 18, 4], strides = [1, 1, 1, 1]} : vector<2x10x18x4xbf16> to vector<2x8x18x4xbf16>
    %12 = vector.extract_strided_slice %11 {offsets = [0, 0, 0, 0], sizes = [2, 8, 16, 4], strides = [1, 1, 1, 1]} : vector<2x8x18x4xbf16> to vector<2x8x16x4xbf16>
    %13 = vector.extract_strided_slice %11 {offsets = [0, 0, 1, 0], sizes = [2, 8, 16, 4], strides = [1, 1, 1, 1]} : vector<2x8x18x4xbf16> to vector<2x8x16x4xbf16>
    %14 = vector.extract_strided_slice %11 {offsets = [0, 0, 2, 0], sizes = [2, 8, 16, 4], strides = [1, 1, 1, 1]} : vector<2x8x18x4xbf16> to vector<2x8x16x4xbf16>
    %15 = vector.extract_strided_slice %10 {offsets = [0, 1, 0, 0], sizes = [2, 8, 18, 4], strides = [1, 1, 1, 1]} : vector<2x10x18x4xbf16> to vector<2x8x18x4xbf16>
    %16 = vector.extract_strided_slice %15 {offsets = [0, 0, 0, 0], sizes = [2, 8, 16, 4], strides = [1, 1, 1, 1]} : vector<2x8x18x4xbf16> to vector<2x8x16x4xbf16>
    %17 = vector.extract_strided_slice %15 {offsets = [0, 0, 1, 0], sizes = [2, 8, 16, 4], strides = [1, 1, 1, 1]} : vector<2x8x18x4xbf16> to vector<2x8x16x4xbf16>
    %18 = vector.extract_strided_slice %15 {offsets = [0, 0, 2, 0], sizes = [2, 8, 16, 4], strides = [1, 1, 1, 1]} : vector<2x8x18x4xbf16> to vector<2x8x16x4xbf16>
    %19 = vector.extract_strided_slice %10 {offsets = [0, 2, 0, 0], sizes = [2, 8, 18, 4], strides = [1, 1, 1, 1]} : vector<2x10x18x4xbf16> to vector<2x8x18x4xbf16>
    %20 = vector.extract_strided_slice %19 {offsets = [0, 0, 0, 0], sizes = [2, 8, 16, 4], strides = [1, 1, 1, 1]} : vector<2x8x18x4xbf16> to vector<2x8x16x4xbf16>
    %21 = vector.extract_strided_slice %19 {offsets = [0, 0, 1, 0], sizes = [2, 8, 16, 4], strides = [1, 1, 1, 1]} : vector<2x8x18x4xbf16> to vector<2x8x16x4xbf16>
    %22 = vector.extract_strided_slice %19 {offsets = [0, 0, 2, 0], sizes = [2, 8, 16, 4], strides = [1, 1, 1, 1]} : vector<2x8x18x4xbf16> to vector<2x8x16x4xbf16>
    %23 = tpu.concatenate %12, %13, %14, %16, %17, %18, %20, %21, %22 in 3 : vector<2x8x16x4xbf16>, vector<2x8x16x4xbf16>, vector<2x8x16x4xbf16>, vector<2x8x16x4xbf16>, vector<2x8x16x4xbf16>, vector<2x8x16x4xbf16>, vector<2x8x16x4xbf16>, vector<2x8x16x4xbf16>, vector<2x8x16x4xbf16> -> vector<2x8x16x36xbf16>
    %24 = vector.shape_cast %23 : vector<2x8x16x36xbf16> to vector<256x36xbf16>
    %c0_39 = arith.constant 0 : index
    %c0_40 = arith.constant 0 : index
    %25 = vector.load %arg13[%c0_39, %c0_40] : memref<36x128xbf16, #tpu.memory_space<vmem>>, vector<36x128xbf16>
    %cst = arith.constant dense<0.000000e+00> : vector<256x128xf32>
    %26 = tpu.matmul %24, %25, %cst {dimension_numbers = #tpu.dot_dimension_numbers<[1], [0], [0], [1], [0, 0, 1, 1], [], []>} : vector<256x36xbf16>, vector<36x128xbf16>, vector<256x128xf32> -> vector<256x128xf32>
    %c0_41 = arith.constant 0 : index
    %c0_42 = arith.constant 0 : index
    %27 = vector.load %arg14[%c0_41, %c0_42] : memref<1x128xf32, #tpu.memory_space<vmem>>, vector<1x128xf32>
    %28 = vector.broadcast %27 : vector<1x128xf32> to vector<256x128xf32>
    %29 = arith.addf %26, %28 : vector<256x128xf32>
    %30 = arith.negf %29 : vector<256x128xf32>
    %31 = math.exp %30 : vector<256x128xf32>
    %cst_43 = arith.constant 1.000000e+00 : f32
    %32 = vector.broadcast %cst_43 : f32 to vector<256x128xf32>
    %33 = arith.addf %32, %31 : vector<256x128xf32>
    %34 = arith.divf %32, %33 : vector<256x128xf32>
    %35 = arith.mulf %29, %34 : vector<256x128xf32>
    %36 = vector.shape_cast %35 : vector<256x128xf32> to vector<2x8x16x128xf32>
    %c0_44 = arith.constant 0 : index
    %c0_45 = arith.constant 0 : index
    %c0_46 = arith.constant 0 : index
    %c0_47 = arith.constant 0 : index
    %37 = vector.load %arg15[%c0_44, %c0_45, %c0_46, %c0_47] : memref<2x8x16x128xf32, #tpu.memory_space<vmem>>, vector<2x8x16x128xf32>
    tpu.vector_store %arg15[%c0_44, %c0_45, %c0_46, %c0_47], %36 {strides = array<i32>} : memref<2x8x16x128xf32, #tpu.memory_space<vmem>>, vector<2x8x16x128xf32>,
    return
  }
  func.func @transform_0(%arg0: i32, %arg1: i32, %arg2: i32) -> (i32, i32, i32, i32) {
    %c8_i32 = arith.constant 8 : i32
    %0 = arith.muli %arg2, %c8_i32 : i32
    %c1_i32 = arith.constant 1 : i32
    %1 = arith.muli %0, %c1_i32 : i32
    %c0_i32 = arith.constant 0 : i32
    %2 = arith.addi %1, %c0_i32 : i32
    %c0_i32_0 = arith.constant 0 : i32
    %c0_i32_1 = arith.constant 0 : i32
    %c0_i32_2 = arith.constant 0 : i32
    return %arg1, %2, %c0_i32_0, %c0_i32_1 : i32, i32, i32, i32
  }
  func.func @transform_1(%arg0: i32, %arg1: i32, %arg2: i32) -> (i32, i32, i32, i32) {
    %c8_i32 = arith.constant 8 : i32
    %0 = arith.muli %arg2, %c8_i32 : i32
    %c1_i32 = arith.constant 1 : i32
    %1 = arith.muli %0, %c1_i32 : i32
    %c1_i32_0 = arith.constant 1 : i32
    %2 = arith.addi %1, %c1_i32_0 : i32
    %c0_i32 = arith.constant 0 : i32
    %c0_i32_1 = arith.constant 0 : i32
    %c0_i32_2 = arith.constant 0 : i32
    return %arg1, %2, %c0_i32, %c0_i32_1 : i32, i32, i32, i32
  }
  func.func @transform_2(%arg0: i32, %arg1: i32, %arg2: i32) -> (i32, i32, i32, i32) {
    %c8_i32 = arith.constant 8 : i32
    %0 = arith.muli %arg2, %c8_i32 : i32
    %c1_i32 = arith.constant 1 : i32
    %1 = arith.muli %0, %c1_i32 : i32
    %c2_i32 = arith.constant 2 : i32
    %2 = arith.addi %1, %c2_i32 : i32
    %c0_i32 = arith.constant 0 : i32
    %c0_i32_0 = arith.constant 0 : i32
    %c0_i32_1 = arith.constant 0 : i32
    return %arg1, %2, %c0_i32, %c0_i32_0 : i32, i32, i32, i32
  }
  func.func @transform_3(%arg0: i32, %arg1: i32, %arg2: i32) -> (i32, i32, i32, i32) {
    %c8_i32 = arith.constant 8 : i32
    %0 = arith.muli %arg2, %c8_i32 : i32
    %c1_i32 = arith.constant 1 : i32
    %1 = arith.muli %0, %c1_i32 : i32
    %c3_i32 = arith.constant 3 : i32
    %2 = arith.addi %1, %c3_i32 : i32
    %c0_i32 = arith.constant 0 : i32
    %c0_i32_0 = arith.constant 0 : i32
    %c0_i32_1 = arith.constant 0 : i32
    return %arg1, %2, %c0_i32, %c0_i32_0 : i32, i32, i32, i32
  }
  func.func @transform_4(%arg0: i32, %arg1: i32, %arg2: i32) -> (i32, i32, i32, i32) {
    %c8_i32 = arith.constant 8 : i32
    %0 = arith.muli %arg2, %c8_i32 : i32
    %c1_i32 = arith.constant 1 : i32
    %1 = arith.muli %0, %c1_i32 : i32
    %c4_i32 = arith.constant 4 : i32
    %2 = arith.addi %1, %c4_i32 : i32
    %c0_i32 = arith.constant 0 : i32
    %c0_i32_0 = arith.constant 0 : i32
    %c0_i32_1 = arith.constant 0 : i32
    return %arg1, %2, %c0_i32, %c0_i32_0 : i32, i32, i32, i32
  }
  func.func @transform_5(%arg0: i32, %arg1: i32, %arg2: i32) -> (i32, i32, i32, i32) {
    %c8_i32 = arith.constant 8 : i32
    %0 = arith.muli %arg2, %c8_i32 : i32
    %c1_i32 = arith.constant 1 : i32
    %1 = arith.muli %0, %c1_i32 : i32
    %c5_i32 = arith.constant 5 : i32
    %2 = arith.addi %1, %c5_i32 : i32
    %c0_i32 = arith.constant 0 : i32
    %c0_i32_0 = arith.constant 0 : i32
    %c0_i32_1 = arith.constant 0 : i32
    return %arg1, %2, %c0_i32, %c0_i32_0 : i32, i32, i32, i32
  }
  func.func @transform_6(%arg0: i32, %arg1: i32, %arg2: i32) -> (i32, i32, i32, i32) {
    %c8_i32 = arith.constant 8 : i32
    %0 = arith.muli %arg2, %c8_i32 : i32
    %c1_i32 = arith.constant 1 : i32
    %1 = arith.muli %0, %c1_i32 : i32
    %c6_i32 = arith.constant 6 : i32
    %2 = arith.addi %1, %c6_i32 : i32
    %c0_i32 = arith.constant 0 : i32
    %c0_i32_0 = arith.constant 0 : i32
    %c0_i32_1 = arith.constant 0 : i32
    return %arg1, %2, %c0_i32, %c0_i32_0 : i32, i32, i32, i32
  }
  func.func @transform_7(%arg0: i32, %arg1: i32, %arg2: i32) -> (i32, i32, i32, i32) {
    %c8_i32 = arith.constant 8 : i32
    %0 = arith.muli %arg2, %c8_i32 : i32
    %c1_i32 = arith.constant 1 : i32
    %1 = arith.muli %0, %c1_i32 : i32
    %c7_i32 = arith.constant 7 : i32
    %2 = arith.addi %1, %c7_i32 : i32
    %c0_i32 = arith.constant 0 : i32
    %c0_i32_0 = arith.constant 0 : i32
    %c0_i32_1 = arith.constant 0 : i32
    return %arg1, %2, %c0_i32, %c0_i32_0 : i32, i32, i32, i32
  }
  func.func @transform_8(%arg0: i32, %arg1: i32, %arg2: i32) -> (i32, i32, i32, i32) {
    %c8_i32 = arith.constant 8 : i32
    %0 = arith.muli %arg2, %c8_i32 : i32
    %c1_i32 = arith.constant 1 : i32
    %1 = arith.muli %0, %c1_i32 : i32
    %c8_i32_0 = arith.constant 8 : i32
    %2 = arith.addi %1, %c8_i32_0 : i32
    %c0_i32 = arith.constant 0 : i32
    %c0_i32_1 = arith.constant 0 : i32
    %c0_i32_2 = arith.constant 0 : i32
    return %arg1, %2, %c0_i32, %c0_i32_1 : i32, i32, i32, i32
  }
  func.func @transform_9(%arg0: i32, %arg1: i32, %arg2: i32) -> (i32, i32, i32, i32) {
    %c8_i32 = arith.constant 8 : i32
    %0 = arith.muli %arg2, %c8_i32 : i32
    %c1_i32 = arith.constant 1 : i32
    %1 = arith.muli %0, %c1_i32 : i32
    %c9_i32 = arith.constant 9 : i32
    %2 = arith.addi %1, %c9_i32 : i32
    %c0_i32 = arith.constant 0 : i32
    %c0_i32_0 = arith.constant 0 : i32
    %c0_i32_1 = arith.constant 0 : i32
    return %arg1, %2, %c0_i32, %c0_i32_0 : i32, i32, i32, i32
  }
  func.func @transform_10(%arg0: i32, %arg1: i32, %arg2: i32) -> (i32, i32) {
    %c0_i32 = arith.constant 0 : i32
    %c0_i32_0 = arith.constant 0 : i32
    return %c0_i32, %arg0 : i32, i32
  }
  func.func @transform_11(%arg0: i32, %arg1: i32, %arg2: i32) -> (i32, i32) {
    %c0_i32 = arith.constant 0 : i32
    %c0_i32_0 = arith.constant 0 : i32
    return %c0_i32, %arg0 : i32, i32
  }
  func.func @transform_12(%arg0: i32, %arg1: i32, %arg2: i32) -> (i32, i32, i32, i32) {
    %c0_i32 = arith.constant 0 : i32
    %c0_i32_0 = arith.constant 0 : i32
    return %arg1, %arg2, %c0_i32, %arg0 : i32, i32, i32, i32
  }
}

</mosaic_0001>

<bundles_post_ra>
// kernel: conv_forward.1
= control target key start
LH: loop header
LB: loop body
LE: loop exit
PB: predicated region body
PF: predicated region fallthrough
CT: control target
= control target key end

     0   :  { %s5682_s0 = inlined_call_operand.vmem [shape: bf16[2,18,18,4], index: 0, kind: input, shape index: {}, may-alias: {0,1,2,3,4,5,6,7,8,9}]   ;;  %s5683_s1 = inlined_call_operand.vmem [shape: bf16[2,18,18,4], index: 1, kind: input, shape index: {}, may-alias: {0,1,2,3,4,5,6,7,8,9}]   ;;  %s5684_s2 = inlined_call_operand.vmem [shape: bf16[2,18,18,4], index: 2, kind: input, shape index: {}, may-alias: {0,1,2,3,4,5,6,7,8,9}]   ;;  %s5685_s3 = inlined_call_operand.vmem [shape: bf16[2,18,18,4], index: 3, kind: input, shape index: {}, may-alias: {0,1,2,3,4,5,6,7,8,9}]   ;;  %s5686_s4 = inlined_call_operand.vmem [shape: bf16[2,18,18,4], index: 4, kind: input, shape index: {}, may-alias: {0,1,2,3,4,5,6,7,8,9}]   ;;  %s5687_s5 = inlined_call_operand.vmem [shape: bf16[2,18,18,4], index: 5, kind: input, shape index: {}, may-alias: {0,1,2,3,4,5,6,7,8,9}]   ;;  %s5688_s6 = inlined_call_operand.vmem [shape: bf16[2,18,18,4], index: 6, kind: input, shape index: {}, may-alias: {0,1,2,3,4,5,6,7,8,9}]   ;;  %s5689_s7 = inlined_call_operand.vmem [shape: bf16[2,18,18,4], index: 7, kind: input, shape index: {}, may-alias: {0,1,2,3,4,5,6,7,8,9}]   ;;  %s5690_s8 = inlined_call_operand.vmem [shape: bf16[2,18,18,4], index: 8, kind: input, shape index: {}, may-alias: {0,1,2,3,4,5,6,7,8,9}]   ;;  %s5691_s9 = inlined_call_operand.vmem [shape: bf16[2,18,18,4], index: 9, kind: input, shape index: {}, may-alias: {0,1,2,3,4,5,6,7,8,9}]   ;;  %s5692_s10 = inlined_call_operand.vmem [shape: bf16[36,128], index: 10, kind: input, shape index: {}]   ;;  %s5693_s11 = inlined_call_operand.vmem [shape: f32[1,128], index: 11, kind: input, shape index: {}]   ;;  %s5694_s12 = inlined_call_operand.vmem [shape: f32[2,16,16,128], index: 12, kind: output, shape index: {}]  }
   0x1   :  { %5713 = sst [smem:[#allocation42_spill]] %s5682_s0 }
   0x2   :  { %5714 = sst [smem:[#allocation43_spill]] %s5683_s1 }
   0x3   :  { %5715 = sst [smem:[#allocation44_spill]] %s5684_s2 }
   0x4   :  { %5716 = sst [smem:[#allocation45_spill]] %s5685_s3 }
   0x5   :  { %5717 = sst [smem:[#allocation46_spill]] %s5686_s4 }
   0x6   :  { %5718 = sst [smem:[#allocation47_spill]] %s5687_s5 }
   0x7   :  { %5719 = sst [smem:[#allocation48_spill]] %s5688_s6 }
   0x8   :  { %5720 = sst [smem:[#allocation49_spill]] %s5689_s7 }
   0x9   :  { %5721 = sst [smem:[#allocation50_spill]] %s5690_s8 }
   0xa   :  { %5722 = sst [smem:[#allocation51_spill]] %s5691_s9 }
   0xb   :  { %5723 = sst [smem:[#allocation52_spill]] %s5692_s10 }
   0xc   :  { %5724 = sst [smem:[#allocation53_spill]] %s5693_s11 }
   0xd   :  { %5725 = sst [smem:[#allocation54_spill]] %s5694_s12 }
   0xe   :  { %s4354_s21 = smov 0   ;;  %s4356_s22 = smov 0  }
   0xf   :  { %s4358_s23 = smov 0   ;;  %s4360_s24 = smov 0  }
  0x10   :  { %s4362_s25 = smov 0   ;;  %s4364_s26 = smov 0  }
  0x11   :  { %s4366_s27 = smov 0   ;;  %s4368_s28 = smov 0  }
  0x12   :  { %s4370_s29 = smov 0   ;;  %s4372_s30 = smov 0  }
  0x13   :  { %s4374_s13 = smov 0   ;;  %s4376_s14 = smov 0  }
  0x14   :  { %s4378_s15 = smov 0   ;;  %s4380_s16 = smov 0  }
  0x15   :  { %s4382_s17 = smov 0   ;;  %s4384_s18 = smov 0  }
  0x16   :  { %s4386_s19 = smov 0   ;;  %s4388_s20 = smov 0  }
  0x17   :  { %s4390_s12 = smov 0   ;;  %s4392_s11 = smov 0  }
  0x18   :  { %s4394_s10 = smov 0   ;;  %s4396_s9 = smov 0  }
  0x19   :  { %s4398_s8 = smov 0   ;;  %s4400_s7 = smov 0  }
  0x1a   :  { %s4402_s6 = smov 0  }
  0x1b LB: > { %5726 = sst [smem:[#allocation13_spill]] %s4183_s21  ;;  %s34_s4 = sadd.s32 1, %s4275_s7  ;;  %s4279_s6 = sphi %s4402_s6, %s22_s6   ;;  %s4275_s7 = sphi %s4400_s7, %s5851_s7   ;;  %s4271_s8 = sphi %s4398_s8, %s5838_s8   ;;  %s4267_s9 = sphi %s4396_s9, %s5850_s9   ;;  %s4263_s10 = sphi %s4394_s10, %s5849_s10   ;;  %s4259_s11 = sphi %s4392_s11, %s5848_s11   ;;  %s4255_s12 = sphi %s4390_s12, %s5847_s12   ;;  %s4251_s20 = sphi %s4388_s20, %s5846_s20   ;;  %s4247_s19 = sphi %s4386_s19, %s5845_s19   ;;  %s4243_s18 = sphi %s4384_s18, %s5844_s18   ;;  %s4239_s17 = sphi %s4382_s17, %s5843_s17   ;;  %s4235_s16 = sphi %s4380_s16, %s5842_s16   ;;  %s4231_s15 = sphi %s4378_s15, %s5841_s15   ;;  %s4227_s14 = sphi %s4376_s14, %s5840_s14   ;;  %s4223_s13 = sphi %s4374_s13, %s5826_s13   ;;  %s4219_s30 = sphi %s4372_s30, %s5825_s30   ;;  %s4215_s29 = sphi %s4370_s29, %s5824_s29   ;;  %s4211_s28 = sphi %s4368_s28, %s5823_s28   ;;  %s4207_s27 = sphi %s4366_s27, %s5822_s27   ;;  %s4203_s26 = sphi %s4364_s26, %s5836_s26   ;;  %s4199_s25 = sphi %s4362_s25, %s5835_s25   ;;  %s4195_s24 = sphi %s4360_s24, %s5833_s24   ;;  %s4191_s23 = sphi %s4358_s23, %s5832_s23   ;;  %s4187_s22 = sphi %s4356_s22, %s5830_s22   ;;  %s4183_s21 = sphi %s4354_s21, %s5821_s21  }
  0x1c   : > { %5727 = sst [smem:[#allocation14_spill]] %s4187_s22  ;;  %p35_p0 = scmp.ge.s32.totalorder %s34_s4, 2 }
  0x1d   : > { %5728 = sst [smem:[#allocation15_spill]] %s4191_s23  ;;  %s4482_s3 = sshll.u32 %s4275_s7, 3 }
  0x1e   : > { %5729 = sst [smem:[#allocation16_spill]] %s4199_s25  ;;  %p59_p1 = scmp.ne.s32.totalorder %s4267_s9, %s4263_s10 }
  0x1f   : > { %5730 = sst [smem:[#allocation17_spill]] %s4207_s27  ;;  %s5853_s4 = smov (%p35_p0, %s34_s4), 0 }
  0x20   : > { %5731 = sst [smem:[#allocation18_spill]] %s4211_s28  ;;  %p60_p2 = scmp.eq.s32.totalorder %s4279_s6, 0 }
  0x21   : > { %5732 = sst [smem:[#allocation19_spill]] %s4215_s29  ;;  %s76_s2 = sadd.s32 1, %s4482_s3 }
  0x22   : > { %5733 = sst [smem:[#allocation20_spill]] %s4219_s30  ;;  %s4492_s5 = sshll.u32 %s5853_s4, 3 }
  0x23   : > { %5734 = sst [smem:[#allocation21_spill]] %s4223_s13  ;;  %s84_s1 = sadd.s32 1, %s4259_s11 }
  0x24   : > { %5735 = sst [smem:[#allocation22_spill]] %s4227_s14  ;;  %s48_s0 = ssub.s32 %s4482_s3, %s4492_s5 }
  0x25   : > { %5736 = sst [smem:[#allocation23_spill]] %s4231_s15  ;;  %p4499_p3 = por %p60_p2, %p59_p1 }
  0x26   : > { %5737 = sst [smem:[#allocation24_spill]] %s4239_s17  ;;  %p50_p4 = scmp.eq.s32.totalorder %s48_s0, 0 }
  0x27   : > { %5738 = sst [smem:[#allocation25_spill]] %s4247_s19  ;;  %s78_s21 = sadd.s32 1, %s4492_s5 }
  0x28   : > { %5739 = sst [smem:[#allocation26_spill]] %s4255_s12  ;;  %s80_s22 = ssub.s32 %s76_s2, %s78_s21 }
  0x29   : > { %5740 = sst [smem:[#allocation27_spill]] %s4263_s10  ;;  %p91_p5 = scmp.ne.s32.totalorder %s4259_s11, %s4255_s12 }
  0x2a   : > { %5741 = sst [smem:[#allocation28_spill]] %s4271_s8  ;;  %s52_s8 = sadd.s32 1, %s4267_s9 }
  0x2b   : > { %5742 = sst [smem:[#allocation29_spill]] %s4275_s7  ;;  %p82_p6 = scmp.eq.s32.totalorder %s80_s22, 0 }
  0x2c   : > { %5743 = sst [smem:[#allocation30_spill]] %s5853_s4  ;;  %p4511_p7 = por %p91_p5, %p60_p2 }
  0x2d   : > { %s5744_s10 = scalar_select %p4499_p3, 1, 0 }
  0x2e   : > { %s4507_s7 = scalar_select %p50_p4, %s4267_s9, %s52_s8  }
  0x2f   : > { %5745 = sst [smem:[#allocation31_spill]] %s5744_s10  ;;  %s108_s10 = sadd.s32 2, %s4482_s3 }
  0x30   : > { %5746 = sst [smem:[#allocation32_spill]] %s4507_s7  ;;  %s110_s0 = sadd.s32 2, %s4492_s5 }
  0x31   : > { %s4518_s23 = scalar_select %p82_p6, %s4259_s11, %s84_s1  }
  0x32   : > { %s112_s2 = ssub.s32 %s108_s10, %s110_s0  ;;  %s116_s8 = sadd.s32 1, %s4251_s20 }
  0x33   : > { %5748 = sst [smem:[#allocation33_spill]] %s4518_s23  ;;  %p114_p8 = scmp.eq.s32.totalorder %s112_s2, 0 }
  0x34   : > { %p123_p9 = scmp.ne.s32.totalorder %s4251_s20, %s4247_s19  ;;  %s140_s21 = sadd.s32 3, %s4482_s3 }
  0x35   : > { %s142_s22 = sadd.s32 3, %s4492_s5  ;;  %s148_s10 = sadd.s32 1, %s4243_s18 }
  0x36   : > { %s4526_s7 = scalar_select %p114_p8, %s4251_s20, %s116_s8  }
  0x37   : > { %p4530_p10 = por %p123_p9, %p60_p2  ;;  %s144_s1 = ssub.s32 %s140_s21, %s142_s22 }
  0x38   : > { %5749 = sst [smem:[#allocation34_spill]] %s4526_s7  ;;  %p146_p11 = scmp.eq.s32.totalorder %s144_s1, 0 }
  0x39   : > { %p155_p12 = scmp.ne.s32.totalorder %s4243_s18, %s4239_s17  ;;  %s172_s23 = sadd.s32 4, %s4482_s3 }
  0x3a   : > { %s4539_s0 = scalar_select %p146_p11, %s4243_s18, %s148_s10  }
  0x3b   : > { %p4543_p13 = por %p155_p12, %p60_p2  ;;  %s174_s8 = sadd.s32 4, %s4492_s5 }
  0x3c   : > { %5751 = sst [smem:[#allocation35_spill]] %s4539_s0  ;;  %s176_s21 = ssub.s32 %s172_s23, %s174_s8 }
  0x3d   : > { %s180_s22 = sadd.s32 1, %s4235_s16  ;;  %p178_p0 = scmp.eq.s32.totalorder %s176_s21, 0 }
  0x3e   : > { %p187_p1 = scmp.ne.s32.totalorder %s4235_s16, %s4231_s15  ;;  %s204_s1 = sadd.s32 5, %s4482_s3 }
  0x3f   : > { %s206_s10 = sadd.s32 5, %s4492_s5  ;;  %s212_s8 = sadd.s32 1, %s4227_s14 }
  0x40   : > { %s4554_s25 = scalar_select %p178_p0, %s4235_s16, %s180_s22  }
  0x41   : > { %p4558_p4 = por %p187_p1, %p60_p2  ;;  %s208_s23 = ssub.s32 %s204_s1, %s206_s10 }
  0x42   : > { %5753 = sst [smem:[#allocation36_spill]] %s4554_s25  ;;  %p210_p5 = scmp.eq.s32.totalorder %s208_s23, 0 }
  0x43   : > { %p219_p6 = scmp.ne.s32.totalorder %s4227_s14, %s4223_s13  ;;  %s236_s21 = sadd.s32 6, %s4482_s3 }
  0x44   : > { %s4567_s0 = scalar_select %p210_p5, %s4227_s14, %s212_s8  }
  0x45   : > { %p4571_p8 = por %p219_p6, %p60_p2  ;;  %s238_s25 = sadd.s32 6, %s4492_s5 }
  0x46   : > { %5755 = sst [smem:[#allocation37_spill]] %s4567_s0  ;;  %s240_s1 = ssub.s32 %s236_s21, %s238_s25 }
  0x47   : > { %s5756_s22 = scalar_select %p4571_p8, 1, 0 }
  0x48   : > { %s244_s10 = sadd.s32 1, %s4219_s30  ;;  %p242_p9 = scmp.eq.s32.totalorder %s240_s1, 0 }
  0x49   : > { %p251_p11 = scmp.ne.s32.totalorder %s4219_s30, %s4215_s29  ;;  %s5757_s23 = sld [smem:[#allocation16_spill]] }
  0x4a   : > { %s268_s13 = sadd.s32 7, %s4482_s3  ;;  %s270_s8 = sadd.s32 7, %s4492_s5 }
  0x4b   : > { %s4582_s0 = scalar_select %p242_p9, %s4219_s30, %s244_s10  }
  0x4c   : > { %p4586_p12 = por %p251_p11, %p60_p2  ;;  %s272_s25 = ssub.s32 %s268_s13, %s270_s8 }
  0x4d   : > { %5758 = sst [smem:[#allocation38_spill]] %s4582_s0  ;;  %p274_p0 = scmp.eq.s32.totalorder %s272_s25, 0 }
  0x4e   : > { %s5759_s15 = scalar_select %p4586_p12, 1, 0 }
  0x4f   : > { %s276_s21 = sadd.s32 1, %s4211_s28  ;;  %p283_p1 = scmp.ne.s32.totalorder %s4211_s28, %s4207_s27 }
  0x50   : > { %5760 = sst [smem:[#allocation39_spill]] %s5759_s15  ;;  %s5761_s1 = sld [smem:[#allocation15_spill]] }
  0x51   : > { %s300_s29 = sadd.s32 8, %s4482_s3  ;;  %s5762_s17 = sld [smem:[#allocation30_spill]] }
  0x52   : > { %s5763_s19 = sld [smem:[#allocation29_spill]]  ;;  %p4599_p5 = por %p283_p1, %p60_p2 }
  0x53   : > { %s4595_s14 = scalar_select %p274_p0, %s4211_s28, %s276_s21  }
  0x54   : > { %s5765_s10 = scalar_select %p4599_p5, 1, 0 }
  0x55   : > { %5764 = sst [smem:[#allocation40_spill]] %s4595_s14  ;;  %s302_s0 = sadd.s32 8, %s4492_s5 }
  0x56   : > { %5766 = sst [smem:[#allocation41_spill]] %s5765_s10  ;;  %s304_s13 = ssub.s32 %s300_s29, %s302_s0 }
  0x57   : > { %s5767_s8 = sld [smem:[#allocation14_spill]]  ;;  %s308_s25 = sadd.s32 1, %s4203_s26 }
  0x58   : > { %s5768_s30 = sld [smem:[#allocation13_spill]]  ;;  %p306_p6 = scmp.eq.s32.totalorder %s304_s13, 0 }
  0x59   : > { %p315_p9 = scmp.ne.s32.totalorder %s4203_s26, %s5757_s23  ;;  %s332_s27 = sadd.s32 9, %s4482_s3 }
  0x5a   : > { %s334_s21 = sadd.s32 9, %s4492_s5  ;;  %s340_s29 = sadd.s32 1, %s4195_s24 }
  0x5b   : > { %s4610_s14 = scalar_select %p306_p6, %s4203_s26, %s308_s25  }
  0x5c   : > { %p4614_p11 = por %p315_p9, %p60_p2  ;;  %s336_s10 = ssub.s32 %s332_s27, %s334_s21 }
  0x5d   : > { %p338_p0 = scmp.eq.s32.totalorder %s336_s10, 0  ;;  %p347_p1 = scmp.ne.s32.totalorder %s4195_s24, %s5761_s1 }
  0x5e   : > { %s5769_s28 = scalar_select %p4614_p11, 1, 0 }
  0x5f   : > { %s416_s0 = ssub.s32 %s5763_s19, %s5762_s17  ;;  %p4628_p5 = por %p347_p1, %p60_p2 }
  0x60   : > { %s4624_s15 = scalar_select %p338_p0, %s4195_s24, %s340_s29  }
  0x61   : > { %p420_p12 = scmp.eq.s32.totalorder %s416_s0, 0  ;;  %s422_s3 = sadd.s32 1, %s5767_s8 }
  0x62   : > { %p432_p6 = scmp.ne.s32.totalorder %s5767_s8, %s5768_s30  ;;  %s5771_s5 = sadd.s32 4294967295, %s4279_s6  }
  0x63   : > { %s5855_s8 = smov (!%p420_p12, %s5767_s8), %s422_s3  ;;  %p433_p9 = scmp.eq.s32.totalorder %s5771_s5, 1 }
  0x64   : > { %p3429_p8 = scmp.ge.s32.totalorder %s4279_s6, 2 }
  0x65   : > { %p4640_p11 = por %p433_p9, %p432_p6 }
  0x66   : > { %468 = sbr.rel (%p3429_p8) target bundleno = 245 (0xf5), region = 24 }
  0x6d   : > { %471 = sbr.rel (!%p4499_p3) target bundleno = 121 (0x79), region = 28  ;;  %s5774_s19 = sld [smem:[#allocation29_spill]] (%p4499_p3) }
  0x6e   : > { %s473_s1 = sand.u32 (%p4499_p3), 1, %s4267_s9   ;;  %s5775_s21 = sld [smem:[#allocation42_spill]] (%p4499_p3) }
  0x6f   : > { %s3681_s13 = smul.u32 (%p4499_p3), 24, %s473_s1 }
  0x71   : > { %s475_s0 = scalar_lea.vmem (%p4499_p3), [#allocation2], %s3681_s13 }
  0x73   : > { %s3682_s10 = smul.u32 (%p4499_p3), 96, %s5774_s19 }
  0x75   : > { %s482_s29 = scalar_lea.vmem %s5775_s21, %s3682_s10 }
  0x76   : > { %v498_v0 = vld [vmem:[%s482_s29] sm:$0xff]   ;;  %v502_v1 = vld [vmem:[%s482_s29 + $0x8] sm:$0xf]  ;;  %v504_v2 = vld [vmem:[%s482_s29 + $0xd8] sm:$0xff]  }
  0x77   : > { %499 = vst [vmem:[%s475_s0] sm:$0xff] %v498_v0   ;;  %503 = vst [vmem:[%s475_s0 + $0x8] sm:$0xf] %v502_v1  ;;  %v508_v3 = vld [vmem:[%s482_s29 + $0xe0] sm:$0xf] }
  0x78   : > { %505 = vst [vmem:[%s475_s0 + $0xc] sm:$0xff] %v504_v2   ;;  %509 = vst [vmem:[%s475_s0 + $0x14] sm:$0xf] %v508_v3 }
  0x79 PF: > { %544 = sbr.rel (!%p4511_p7) target bundleno = 133 (0x85), region = 69  ;;  %s5776_s3 = sld [smem:[#allocation29_spill]] (%p4511_p7) }
  0x7a   : > { %s546_s5 = sand.u32 (%p4511_p7), 1, %s4259_s11   ;;  %s5777_s30 = sld [smem:[#allocation43_spill]] (%p4511_p7) }
  0x7b   : > { %s3683_s19 = smul.u32 (%p4511_p7), 24, %s546_s5 }
  0x7d   : > { %s548_s13 = scalar_lea.vmem (%p4511_p7), [#allocation3], %s3683_s19 }
  0x7f   : > { %s3435_s17 = smul.u32 (%p4511_p7), 96, %s5776_s3 }
  0x81   : > { %s3124_s25 = scalar_lea.vmem %s5777_s30, %s3435_s17 }
  0x82   : > { %v3436_v4 = vld [vmem:[%s3124_s25 + $0xc] sm:$0xff]   ;;  %v3438_v5 = vld [vmem:[%s3124_s25 + $0x14] sm:$0xf]  ;;  %v3439_v6 = vld [vmem:[%s3124_s25 + $0xe4] sm:$0xff]  }
  0x83   : > { %573 = vst [vmem:[%s548_s13] sm:$0xff] %v3436_v4   ;;  %577 = vst [vmem:[%s548_s13 + $0x8] sm:$0xf] %v3438_v5  ;;  %v3441_v7 = vld [vmem:[%s3124_s25 + $0xec] sm:$0xf] }
  0x84   : > { %579 = vst [vmem:[%s548_s13 + $0xc] sm:$0xff] %v3439_v6   ;;  %583 = vst [vmem:[%s548_s13 + $0x14] sm:$0xf] %v3441_v7 }
  0x85 PF: > { %618 = sbr.rel (!%p4530_p10) target bundleno = 145 (0x91), region = 110  ;;  %s5778_s4 = sld [smem:[#allocation29_spill]] (%p4530_p10) }
  0x86   : > { %s620_s21 = sand.u32 (%p4530_p10), 1, %s4251_s20   ;;  %s5779_s17 = sld [smem:[#allocation44_spill]] (%p4530_p10) }
  0x87   : > { %s3684_s0 = smul.u32 (%p4530_p10), 24, %s620_s21 }
  0x89   : > { %s622_s19 = scalar_lea.vmem (%p4530_p10), [#allocation4], %s3684_s0 }
  0x8b   : > { %s3444_s29 = smul.u32 (%p4530_p10), 96, %s5778_s4 }
  0x8d   : > { %s3133_s1 = scalar_lea.vmem %s5779_s17, %s3444_s29 }
  0x8e   : > { %v3445_v8 = vld [vmem:[%s3133_s1 + $0x18] sm:$0xff]   ;;  %v3447_v9 = vld [vmem:[%s3133_s1 + $0x20] sm:$0xf]  ;;  %v3448_v10 = vld [vmem:[%s3133_s1 + $0xf0] sm:$0xff]  }
  0x8f   : > { %647 = vst [vmem:[%s622_s19] sm:$0xff] %v3445_v8   ;;  %651 = vst [vmem:[%s622_s19 + $0x8] sm:$0xf] %v3447_v9  ;;  %v3450_v11 = vld [vmem:[%s3133_s1 + $0xf8] sm:$0xf] }
  0x90   : > { %653 = vst [vmem:[%s622_s19 + $0xc] sm:$0xff] %v3448_v10   ;;  %657 = vst [vmem:[%s622_s19 + $0x14] sm:$0xf] %v3450_v11 }
  0x91 PF: > { %692 = sbr.rel (!%p4543_p13) target bundleno = 157 (0x9d), region = 151  ;;  %s5780_s12 = sld [smem:[#allocation29_spill]] (%p4543_p13) }
  0x92   : > { %s694_s10 = sand.u32 (%p4543_p13), 1, %s4243_s18   ;;  %s5781_s21 = sld [smem:[#allocation45_spill]] (%p4543_p13) }
  0x93   : > { %s3685_s25 = smul.u32 (%p4543_p13), 24, %s694_s10 }
  0x95   : > { %s696_s0 = scalar_lea.vmem (%p4543_p13), [#allocation5], %s3685_s25 }
  0x97   : > { %s3453_s30 = smul.u32 (%p4543_p13), 96, %s5780_s12 }
  0x99   : > { %s3142_s29 = scalar_lea.vmem %s5781_s21, %s3453_s30 }
  0x9a   : > { %v3454_v12 = vld [vmem:[%s3142_s29 + $0x24] sm:$0xff]   ;;  %v3456_v13 = vld [vmem:[%s3142_s29 + $0x2c] sm:$0xf]  ;;  %v3457_v14 = vld [vmem:[%s3142_s29 + $0xfc] sm:$0xff]  }
  0x9b   : > { %721 = vst [vmem:[%s696_s0] sm:$0xff] %v3454_v12   ;;  %725 = vst [vmem:[%s696_s0 + $0x8] sm:$0xf] %v3456_v13  ;;  %v3459_v15 = vld [vmem:[%s3142_s29 + $0x104] sm:$0xf] }
  0x9c   : > { %727 = vst [vmem:[%s696_s0 + $0xc] sm:$0xff] %v3457_v14   ;;  %731 = vst [vmem:[%s696_s0 + $0x14] sm:$0xf] %v3459_v15 }
  0x9d PF: > { %766 = sbr.rel (!%p4558_p4) target bundleno = 169 (0xa9), region = 192  ;;  %s5782_s2 = sld [smem:[#allocation29_spill]] (%p4558_p4) }
  0x9e   : > { %s768_s3 = sand.u32 (%p4558_p4), 1, %s4235_s16   ;;  %s5783_s12 = sld [smem:[#allocation46_spill]] (%p4558_p4) }
  0x9f   : > { %s3686_s17 = smul.u32 (%p4558_p4), 24, %s768_s3 }
  0xa1   : > { %s770_s30 = scalar_lea.vmem (%p4558_p4), [#allocation6], %s3686_s17 }
  0xa3   : > { %s3462_s5 = smul.u32 (%p4558_p4), 96, %s5782_s2 }
  0xa5   : > { %s3151_s10 = scalar_lea.vmem %s5783_s12, %s3462_s5 }
  0xa6   : > { %v3463_v16 = vld [vmem:[%s3151_s10 + $0x30] sm:$0xff]   ;;  %v3465_v17 = vld [vmem:[%s3151_s10 + $0x38] sm:$0xf]  ;;  %v3466_v18 = vld [vmem:[%s3151_s10 + $0x108] sm:$0xff]  }
  0xa7   : > { %795 = vst [vmem:[%s770_s30] sm:$0xff] %v3463_v16   ;;  %799 = vst [vmem:[%s770_s30 + $0x8] sm:$0xf] %v3465_v17  ;;  %v3468_v19 = vld [vmem:[%s3151_s10 + $0x110] sm:$0xf] }
  0xa8   : > { %801 = vst [vmem:[%s770_s30 + $0xc] sm:$0xff] %v3466_v18   ;;  %805 = vst [vmem:[%s770_s30 + $0x14] sm:$0xf] %v3468_v19 }
  0xa9 PF: > { %p5784_p2 = scmp.ne.s32.totalorder %s5756_s22, 0 }
  0xaa   : > { %s5785_s7 = sld [smem:[#allocation22_spill]] (%p5784_p2)  ;;  %s5786_s25 = sld [smem:[#allocation29_spill]] (%p5784_p2) }
  0xab   : > { %840 = sbr.rel (!%p5784_p2) target bundleno = 182 (0xb6), region = 233  ;;  %s5787_s2 = sld [smem:[#allocation47_spill]] (%p5784_p2) }
  0xb0   : > { %s842_s13 = sand.u32 (%p5784_p2), 1, %s5785_s7   ;;  %s3471_s4 = smul.u32 (%p5784_p2), 96, %s5786_s25 }
  0xb1   : > { %s3687_s21 = smul.u32 (%p5784_p2), 24, %s842_s13 }
  0xb2   : > { %s3160_s3 = scalar_lea.vmem %s5787_s2, %s3471_s4 }
  0xb3   : > { %v3472_v20 = vld [vmem:[%s3160_s3 + $0x3c] sm:$0xff]   ;;  %v3474_v21 = vld [vmem:[%s3160_s3 + $0x44] sm:$0xf]  ;;  %v3475_v22 = vld [vmem:[%s3160_s3 + $0x114] sm:$0xff]   ;;  %s844_s5 = scalar_lea.vmem [#allocation7], %s3687_s21 }
  0xb4   : > { %869 = vst [vmem:[%s844_s5] sm:$0xff] %v3472_v20   ;;  %873 = vst [vmem:[%s844_s5 + $0x8] sm:$0xf] %v3474_v21  ;;  %v3477_v23 = vld [vmem:[%s3160_s3 + $0x11c] sm:$0xf] }
  0xb5   : > { %875 = vst [vmem:[%s844_s5 + $0xc] sm:$0xff] %v3475_v22   ;;  %879 = vst [vmem:[%s844_s5 + $0x14] sm:$0xf] %v3477_v23 }
  0xb6 PF: > { %s5788_s22 = sld [smem:[#allocation39_spill]] }
  0xbc   : > { %p5789_p3 = scmp.ne.s32.totalorder %s5788_s22, 0 }
  0xbd   : > { %s5790_s17 = sld [smem:[#allocation20_spill]] (%p5789_p3)  ;;  %s5791_s1 = sld [smem:[#allocation29_spill]] (%p5789_p3) }
  0xbe   : > { %914 = sbr.rel (!%p5789_p3) target bundleno = 201 (0xc9), region = 274  ;;  %s5792_s25 = sld [smem:[#allocation48_spill]] (%p5789_p3) }
  0xc3   : > { %s916_s19 = sand.u32 (%p5789_p3), 1, %s5790_s17   ;;  %s3480_s12 = smul.u32 (%p5789_p3), 96, %s5791_s1 }
  0xc4   : > { %s3688_s10 = smul.u32 (%p5789_p3), 24, %s916_s19 }
  0xc5   : > { %s3169_s13 = scalar_lea.vmem %s5792_s25, %s3480_s12 }
  0xc6   : > { %v3481_v24 = vld [vmem:[%s3169_s13 + $0x48] sm:$0xff]   ;;  %v3483_v25 = vld [vmem:[%s3169_s13 + $0x50] sm:$0xf]  ;;  %v3484_v26 = vld [vmem:[%s3169_s13 + $0x120] sm:$0xff]   ;;  %s918_s4 = scalar_lea.vmem [#allocation8], %s3688_s10 }
  0xc7   : > { %943 = vst [vmem:[%s918_s4] sm:$0xff] %v3481_v24   ;;  %947 = vst [vmem:[%s918_s4 + $0x8] sm:$0xf] %v3483_v25  ;;  %v3486_v27 = vld [vmem:[%s3169_s13 + $0x128] sm:$0xf] }
  0xc8   : > { %949 = vst [vmem:[%s918_s4 + $0xc] sm:$0xff] %v3484_v26   ;;  %953 = vst [vmem:[%s918_s4 + $0x14] sm:$0xf] %v3486_v27 }
  0xc9 PF: > { %s5793_s21 = sld [smem:[#allocation41_spill]] }
  0xcf   : > { %p5794_p7 = scmp.ne.s32.totalorder %s5793_s21, 0 }
  0xd0   : > { %s5795_s29 = sld [smem:[#allocation18_spill]] (%p5794_p7)  ;;  %s5796_s0 = sld [smem:[#allocation29_spill]] (%p5794_p7) }
  0xd1   : > { %988 = sbr.rel (!%p5794_p7) target bundleno = 220 (0xdc), region = 315  ;;  %s5797_s1 = sld [smem:[#allocation49_spill]] (%p5794_p7) }
  0xd6   : > { %s990_s2 = sand.u32 (%p5794_p7), 1, %s5795_s29   ;;  %s3489_s3 = smul.u32 (%p5794_p7), 96, %s5796_s0 }
  0xd7   : > { %s3689_s5 = smul.u32 (%p5794_p7), 24, %s990_s2 }
  0xd8   : > { %s3178_s19 = scalar_lea.vmem %s5797_s1, %s3489_s3 }
  0xd9   : > { %v3490_v28 = vld [vmem:[%s3178_s19 + $0x54] sm:$0xff]   ;;  %v3492_v29 = vld [vmem:[%s3178_s19 + $0x5c] sm:$0xf]  ;;  %v3493_v30 = vld [vmem:[%s3178_s19 + $0x12c] sm:$0xff]   ;;  %s992_s12 = scalar_lea.vmem [#allocation9], %s3689_s5 }
  0xda   : > { %1017 = vst [vmem:[%s992_s12] sm:$0xff] %v3490_v28   ;;  %1021 = vst [vmem:[%s992_s12 + $0x8] sm:$0xf] %v3492_v29  ;;  %v3495_v31 = vld [vmem:[%s3178_s19 + $0x134] sm:$0xf] }
  0xdb   : > { %1023 = vst [vmem:[%s992_s12 + $0xc] sm:$0xff] %v3493_v30   ;;  %1027 = vst [vmem:[%s992_s12 + $0x14] sm:$0xf] %v3495_v31 }
  0xdc PF: > { %p5798_p10 = scmp.ne.s32.totalorder %s5769_s28, 0 }
  0xdd   : > { %s5799_s10 = sld [smem:[#allocation29_spill]] (%p5798_p10)  ;;  %s1064_s30 = sand.u32 (%p5798_p10), 1, %s4203_s26  }
  0xde   : > { %1062 = sbr.rel (!%p5798_p10) target bundleno = 233 (0xe9), region = 356  ;;  %s5800_s21 = sld [smem:[#allocation50_spill]] (%p5798_p10) }
  0xdf   : > { %s3690_s25 = smul.u32 (%p5798_p10), 24, %s1064_s30 }
  0xe1   : > { %s1066_s0 = scalar_lea.vmem (%p5798_p10), [#allocation10], %s3690_s25 }
  0xe3   : > { %s3498_s7 = smul.u32 (%p5798_p10), 96, %s5799_s10 }
  0xe5   : > { %s3187_s29 = scalar_lea.vmem %s5800_s21, %s3498_s7 }
  0xe6   : > { %v3499_v32 = vld [vmem:[%s3187_s29 + $0x60] sm:$0xff]   ;;  %v3501_v33 = vld [vmem:[%s3187_s29 + $0x68] sm:$0xf]  ;;  %v3502_v34 = vld [vmem:[%s3187_s29 + $0x138] sm:$0xff]  }
  0xe7   : > { %1091 = vst [vmem:[%s1066_s0] sm:$0xff] %v3499_v32   ;;  %1095 = vst [vmem:[%s1066_s0 + $0x8] sm:$0xf] %v3501_v33  ;;  %v3504_v35 = vld [vmem:[%s3187_s29 + $0x140] sm:$0xf] }
  0xe8   : > { %1097 = vst [vmem:[%s1066_s0 + $0xc] sm:$0xff] %v3502_v34   ;;  %1101 = vst [vmem:[%s1066_s0 + $0x14] sm:$0xf] %v3504_v35 }
  0xe9 PF: > { %1136 = sbr.rel (!%p4628_p5) target bundleno = 245 (0xf5), region = 397  ;;  %s5801_s28 = sld [smem:[#allocation29_spill]] (%p4628_p5) }
  0xea   : > { %s1138_s2 = sand.u32 (%p4628_p5), 1, %s4195_s24   ;;  %s5802_s1 = sld [smem:[#allocation51_spill]] (%p4628_p5) }
  0xeb   : > { %s3691_s5 = smul.u32 (%p4628_p5), 24, %s1138_s2 }
  0xed   : > { %s1140_s12 = scalar_lea.vmem (%p4628_p5), [#allocation11], %s3691_s5 }
  0xef   : > { %s3507_s3 = smul.u32 (%p4628_p5), 96, %s5801_s28 }
  0xf1   : > { %s3196_s19 = scalar_lea.vmem %s5802_s1, %s3507_s3 }
  0xf2   : > { %v3508_v36 = vld [vmem:[%s3196_s19 + $0x6c] sm:$0xff]   ;;  %v3510_v37 = vld [vmem:[%s3196_s19 + $0x74] sm:$0xf]  ;;  %v3511_v38 = vld [vmem:[%s3196_s19 + $0x144] sm:$0xff]  }
  0xf3   : > { %1165 = vst [vmem:[%s1140_s12] sm:$0xff] %v3508_v36   ;;  %1169 = vst [vmem:[%s1140_s12 + $0x8] sm:$0xf] %v3510_v37  ;;  %v3513_v39 = vld [vmem:[%s3196_s19 + $0x14c] sm:$0xf] }
  0xf4   : > { %1171 = vst [vmem:[%s1140_s12 + $0xc] sm:$0xff] %v3511_v38   ;;  %1175 = vst [vmem:[%s1140_s12 + $0x14] sm:$0xf] %v3513_v39 }
  0xf5 PF: > { %p3514_p13 = scmp.ge.s32.totalorder %s4279_s6, 1  ;;  %p1209_p4 = scmp.lt.s32.totalorder %s4279_s6, 3 }
  0xf7   : > { %p1210_p8 = pnand %p3514_p13, %p1209_p4 }
  0xf8   : > { %s5803_s23 = sld [smem:[#allocation27_spill]] (!%p1210_p8)  ;;  %s5804_s10 = sld [smem:[#allocation26_spill]] (!%p1210_p8)  ;;  %vm1814_vm0 = vcmask (!%p1210_p8), 1046528   ;;  %vm1589_vm1 = vsmask.f32 (!%p1210_p8), 7424  ;;  %vm2503_vm2 = vcmask (!%p1210_p8), 1041408  }
  0xf9   : > { %1213 = sbr.rel (%p1210_p8) target bundleno = 888 (0x378), region = 438  ;;  %s5805_s29 = sld [smem:[#allocation25_spill]] (!%p1210_p8)  ;;  %vm2179_vm3 = vcmask (!%p1210_p8), 31744   ;;  %vm2212_vm4 = vcmask (!%p1210_p8), 64512   ;;  %vm2245_vm5 = vcmask (!%p1210_p8), 97280   ;;  %vm2278_vm6 = vcmask (!%p1210_p8), 130048  }
  0xfa   : > { %s4281_s0 = smov (!%p1210_p8), 8   ;;  %s5806_s28 = sld [smem:[#allocation24_spill]] (!%p1210_p8)  ;;  %vm2311_vm7 = vcmask (!%p1210_p8), 162816   ;;  %vm2344_vm8 = vcmask (!%p1210_p8), 195584   ;;  %vm2377_vm9 = vcmask (!%p1210_p8), 228352   ;;  %vm2410_vm10 = vcmask (!%p1210_p8), 261120  }
  0xfb   : > { %s4282_s1 = smov (!%p1210_p8), 4   ;;  %s5807_s19 = sld [smem:[#allocation23_spill]] (!%p1210_p8)  ;;  %vm2470_vm11 = vcmask (!%p1210_p8), 293888  }
  0xfc   : > { %s5808_s12 = sld [smem:[#allocation21_spill]] (!%p1210_p8) }
  0xfe   : > { %s1216_s30 = sand.u32 (!%p1210_p8), 1, %s5803_s23   ;;  %s1223_s25 = sand.u32 (!%p1210_p8), 1, %s5804_s10  }
  0xff   : > { %s3692_s7 = smul.u32 (!%p1210_p8), 24, %s1216_s30  ;;  %s1230_s2 = sand.u32 (!%p1210_p8), 1, %s5805_s29  }
 0x100   : > { %s3693_s13 = smul.u32 24, %s1223_s25  ;;  %s1237_s5 = sand.u32 1, %s5806_s28  }
 0x101   : > { %s1218_s4 = scalar_lea.vmem [#allocation2], %s3692_s7  ;;  %s3694_s3 = smul.u32 24, %s1230_s2 }
 0x102   : > { %v4719_v40 = vld [vmem:[%s1218_s4 + $0xc] sm:$0xff]   ;;  %v3911_v41 = vld [vmem:[%s1218_s4 + $0x14] ss:$0 sps:$4 sm:$0x11]   ;;  %v4721_v42 = vld [vmem:[%s1218_s4] sm:$0xff]   ;;  %s1225_s21 = scalar_lea.vmem [#allocation3], %s3693_s13 }
 0x103   : > { %v1839_v43 = vrot.slane %v4719_v40, 1  ;;  %v1840_v44 = vrot.slane %v3911_v41, 1  ;;  %v3913_v45 = vld [vmem:[%s1218_s4 + $0x8] ss:$0 sps:$4 sm:$0x11]   ;;  %v4724_v46 = vld [vmem:[%s1225_s21 + $0xc] sm:$0xff]  }
 0x104   : > { %v1815_v47 = vrot.slane %v4721_v42, 1  ;;  %v4727_v48 = vld [vmem:[%s1225_s21] sm:$0xff]   ;;  %v1816_v50 = vrot.slane %v3913_v45, 1  ;;  %v3915_v51 = vld [vmem:[%s1225_s21 + $0x14] ss:$0 sps:$4 sm:$0x11]  }
 0x105   : > { %v1841_v49 = vsel %vm1814_vm0, %v1839_v43, %v1840_v44  ;;  %v1842_v52 = vrot.slane %v4724_v46, 1  ;;  %v1818_v53 = vrot.slane %v4727_v48, 1  ;;  %v1843_v55 = vrot.slane %v3915_v51, 1  ;;  %v3917_v56 = vld [vmem:[%s1225_s21 + $0x8] ss:$0 sps:$4 sm:$0x11]  }
 0x106   : > { %1879 = vrot.lane.b32.xlu1 %v1841_v49, %s4281_s0  ;;  %v1817_v54 = vsel %vm1814_vm0, %v1815_v47, %v1816_v50  ;;  %v1603_v57 = vshrl.u32 %v4727_v48, 16  ;;  %v1605_v58 = vshll.u32 %v4727_v48, 16  ;;  %v1591_v59 = vshrl.u32 %v4721_v42, 16  ;;  %s1232_s22 = scalar_lea.vmem [#allocation4], %s3694_s3  ;;  %s3695_s17 = smul.u32 24, %s1237_s5 }
 0x107   : > { %1863 = vrot.lane.b32.xlu0 %v1817_v54, %s4281_s0  ;;  %v1593_v60 = vshll.u32 %v4721_v42, 16  ;;  %v4741_v61 = vsel %vm1814_vm0, %v1842_v52, %v1843_v55  ;;  %v1819_v62 = vrot.slane %v3917_v56, 1  ;;  %v1610_v63 = vshll.u32 %v3917_v56, 16  ;;  %v4760_v22 = vld [vmem:[%s1232_s22 + $0xc] sm:$0xff]   ;;  %v4762_v24 = vld [vmem:[%s1232_s22] sm:$0xff]   ;;  %s4283_s10 = smov 12  }
 0x108   : > { %v1598_v0 = vshll.u32 %v3913_v45, 16  ;;  %v1607_v1 = vrot.slane %v1605_v58, 1  ;;  %v1699_v3 = vshrl.u32 %v4724_v46, 16  ;;  %v1701_v4 = vshll.u32 %v4724_v46, 16  ;;  %s4764_s23 = scalar_lea.vmem [#allocation5], %s3695_s17  ;;  %s1244_s30 = sand.u32 1, %s5807_s19  }
 0x109   : > { %v1595_v2 = vrot.slane %v1593_v60, 1  ;;  %v4749_v5 = vsel %vm1814_vm0, %v1818_v53, %v1819_v62  ;;  %v1612_v6 = vrot.slane %v1610_v63, 1  ;;  %v1706_v8 = vshll.u32 %v3915_v51, 16  ;;  %v3920_v26 = vld [vmem:[%s1232_s22 + $0x14] ss:$0 sps:$4 sm:$0x11]  }
 0x10a   : > { %1881 = vrot.lane.b32.xlu1 %v4741_v61, %s4281_s0  ;;  %v1600_v7 = vrot.slane %v1598_v0, 1  ;;  %v1608_v9 = vor.u32 %v1607_v1, %v1603_v57  ;;  %v1703_v11 = vrot.slane %v1701_v4, 1  ;;  %v1687_v13 = vshrl.u32 %v4719_v40, 16  ;;  %v3921_v28 = vld [vmem:[%s1232_s22 + $0x8] ss:$0 sps:$4 sm:$0x11]  }
 0x10b   : > { %1865 = vrot.lane.b32.xlu0 %v4749_v5, %s4281_s0  ;;  %v1596_v10 = vor.u32 %v1595_v2, %v1591_v59  ;;  %v1708_v12 = vrot.slane %v1706_v8, 1  ;;  %v1689_v14 = vshll.u32 %v4719_v40, 16  ;;  %v1694_v15 = vshll.u32 %v3911_v41, 16  ;;  %s1251_s7 = sand.u32 1, %s5808_s12   ;;  %s5809_s25 = sld [smem:[#allocation19_spill]]  ;;  %v4812_v51 = vld [vmem:[%s4764_s23 + $0xc] sm:$0xff]  }
 0x10c   : > { %v1613_v16 = vsel %vm1589_vm1, %v1608_v9, %v1612_v6  ;;  %v1704_v18 = vor.u32 %v1703_v11, %v1699_v3  ;;  %v1713_v27 = vshll.u32 %v4760_v22, 16  ;;  %v1617_v29 = vshll.u32 %v4762_v24, 16  ;;  %s3696_s13 = smul.u32 24, %s1244_s30  ;;  %s4284_s28 = smov 16   ;;  %v4818_v53 = vld [vmem:[%s4764_s23] sm:$0xff]  }
 0x10d   : > { %v1601_v17 = vsel %vm1589_vm1, %v1596_v10, %v1600_v7  ;;  %v1691_v19 = vrot.slane %v1689_v14, 1  ;;  %v1696_v20 = vrot.slane %v1694_v15, 1  ;;  %v1711_v30 = vshrl.u32 %v4760_v22, 16  ;;  %s3697_s4 = smul.u32 24, %s1251_s7  ;;  %s5810_s5 = sld [smem:[#allocation17_spill]] }
 0x10e   : > { %1784 = vrot.lane.b32.xlu1 %v1613_v16, %s4282_s1  ;;  %v1709_v21 = vsel %vm1589_vm1, %v1704_v18, %v1708_v12  ;;  %v1715_v31 = vrot.slane %v1713_v27, 1  ;;  %v1718_v32 = vshll.u32 %v3920_v26, 16  ;;  %v1615_v33 = vshrl.u32 %v4762_v24, 16  ;;  %s4781_s21 = scalar_lea.vmem [#allocation6], %s3696_s13  ;;  %s4285_s17 = smov 20  }
 0x10f   : > { %1782 = vrot.lane.b32.xlu0 %v1601_v17, %s4282_s1  ;;  %v1692_v23 = vor.u32 %v1691_v19, %v1687_v13  ;;  %v1619_v34 = vrot.slane %v1617_v29, 1  ;;  %v1622_v35 = vshll.u32 %v3921_v28, 16  ;;  %s4787_s2 = scalar_lea.vmem [#allocation7], %s3697_s4  ;;  %v1845_v44 = vrot.slane %v4760_v22, 1  ;;  %s5811_s30 = sld [smem:[#allocation52_spill]]  ;;  %v4882_v17 = vld [vmem:[%s4781_s21] sm:$0xff]  }
 0x110   : > { %v1716_v36 = vor.u32 %v1715_v31, %v1711_v30  ;;  %v1720_v37 = vrot.slane %v1718_v32, 1  ;;  %v1846_v45 = vrot.slane %v3920_v26, 1  ;;  %v1821_v47 = vrot.slane %v4762_v24, 1  ;;  %v3924_v54 = vld [vmem:[%s4764_s23 + $0x14] ss:$0 sps:$4 sm:$0x11]  }
 0x111   : > { %v1697_v25 = vsel %vm1589_vm1, %v1692_v23, %v1696_v20  ;;  %v1620_v38 = vor.u32 %v1619_v34, %v1615_v33  ;;  %v1624_v39 = vrot.slane %v1622_v35, 1  ;;  %s1258_s29 = sand.u32 1, %s5809_s25   ;;  %v1822_v49 = vrot.slane %v3921_v28, 1  ;;  %v3925_v56 = vld [vmem:[%s4764_s23 + $0x8] ss:$0 sps:$4 sm:$0x11]  }
 0x112   : > { %1800 = vrot.lane.b32.xlu1 %v1709_v21, %s4282_s1  ;;  %v4791_v41 = vsel %vm1589_vm1, %v1716_v36, %v1720_v37  ;;  %s3698_s3 = smul.u32 24, %s1258_s29  ;;  %v4809_v50 = vsel %vm1814_vm0, %v1845_v44, %v1846_v45  ;;  %v1725_v55 = vshll.u32 %v4812_v51, 16  ;;  %v1629_v57 = vshll.u32 %v4818_v53, 16  ;;  %s4286_s25 = smov 24   ;;  %v4919_v45 = vld [vmem:[%s4787_s2] sm:$0xff]  }
 0x113   : > { %1798 = vrot.lane.b32.xlu0 %v1697_v25, %s4282_s1  ;;  %v4794_v43 = vsel %vm1589_vm1, %v1620_v38, %v1624_v39  ;;  %v4815_v52 = vsel %vm1814_vm0, %v1821_v47, %v1822_v49  ;;  %s1265_s7 = sand.u32 1, %s5810_s5   ;;  %v1723_v59 = vshrl.u32 %v4812_v51, 16  ;;  %v1627_v62 = vshrl.u32 %v4818_v53, 16  ;;  %s4287_s12 = smov 28  }
 0x114   : > { %s4802_s22 = scalar_lea.vmem [#allocation8], %s3698_s3  ;;  %s3699_s13 = smul.u32 24, %s1265_s7  ;;  %v1727_v60 = vrot.slane %v1725_v55, 1  ;;  %v1631_v63 = vrot.slane %v1629_v57, 1  ;;  %v1634_v0 = vshll.u32 %v3925_v56, 16  ;;  %v1848_v10 = vrot.slane %v4812_v51, 1 }
 0x115   : > { %s5812_s4 = smov %s5811_s30  ;;  %v3938_v58 = vld [vmem:[%s5811_s30] sm:$0xff]   ;;  %s4288_s30 = smov 32   ;;  %v1849_v11 = vrot.slane %v3924_v54, 1  ;;  %v1824_v12 = vrot.slane %v4818_v53, 1  ;;  %v1825_v13 = vrot.slane %v3925_v56, 1  ;;  %v1639_v27 = vshrl.u32 %v4882_v17, 16 }
 0x116   : > { %1921 = vrot.lane.b32.xlu1 %v4724_v46, %s4283_s10  ;;  %3635 = vmatprep.subr.bf16.mxu0 %v3938_v58  ;;  %v3939_v1 = vld [vmem:[%s5812_s4 + $0x8] sm:$0xff]   ;;  %s4841_s3 = scalar_lea.vmem [#allocation9], %s3699_s13  ;;  %v1728_v2 = vor.u32 %v1727_v60, %v1723_v59  ;;  %v1632_v4 = vor.u32 %v1631_v63, %v1627_v62  ;;  %v3942_v6 = vld [vmem:[%s5812_s4 + $0x10] ss:$0 sps:$4 sm:$0x33]   ;;  %s5813_s7 = sld [smem:[#allocation16_spill]] }
 0x117   : > { %1905 = vrot.lane.b32.xlu0 %v4727_v48, %s4283_s10  ;;  %3673 = vmatprep.subr.bf16.mxu1 %v3938_v58  ;;  %v2505_v8 = vsel %vm2503_vm2, %v3942_v6, 0  ;;  %v1850_v14 = vsel %vm1814_vm0, %v1848_v10, %v1849_v11  ;;  %v1826_v15 = vsel %vm1814_vm0, %v1824_v12, %v1825_v13  ;;  %v3928_v18 = vld [vmem:[%s4781_s21 + $0x14] ss:$0 sps:$4 sm:$0x11]   ;;  %v1827_v38 = vrot.slane %v4882_v17, 1 }
 0x118   : > { %3636 = vmatpush3.bf16.msra.mxu0 %v3938_v58  ;;  %3676 = vmatpush3.bf16.msra.mxu1 %v3938_v58  ;;  %v3929_v20 = vld [vmem:[%s4781_s21 + $0x8] ss:$0 sps:$4 sm:$0x11]   ;;  %v1742_v26 = vshll.u32 %v3928_v18, 16  ;;  %v1852_v37 = vrot.slane %v3928_v18, 1  ;;  %v1651_v57 = vshrl.u32 %v4919_v45, 16 }
 0x119   : > { %3637 = vmatprep.subr.bf16.mxu0 %v3939_v1  ;;  %3674 = vmatprep.subr.bf16.mxu1 %v3939_v1  ;;  %v1646_v29 = vshll.u32 %v3929_v20, 16  ;;  %v1828_v39 = vrot.slane %v3929_v20, 1  ;;  %v3932_v47 = vld [vmem:[%s4787_s2 + $0x14] ss:$0 sps:$4 sm:$0x11]  }
 0x11a   : > { %1923 = vrot.lane.b32.xlu1 %v4760_v22, %s4283_s10  ;;  %v1744_v31 = vrot.slane %v1742_v26, 1  ;;  %v1754_v56 = vshll.u32 %v3932_v47, 16  ;;  %v4988_v26 = vld [vmem:[%s4802_s22] sm:$0xff]  }
 0x11b   : > { %1907 = vrot.lane.b32.xlu0 %v4762_v24, %s4283_s10  ;;  %v1648_v33 = vrot.slane %v1646_v29, 1  ;;  %v1829_v44 = vsel %vm1814_vm0, %v1827_v38, %v1828_v39  ;;  %v1663_v38 = vshrl.u32 %v4988_v26, 16 }
 0x11c   : > { %3638 = vmatpush3.bf16.msra.mxu0 %v3939_v1  ;;  %3677 = vmatpush3.bf16.msra.mxu1 %v3939_v1  ;;  %s1272_s13 = sand.u32 1, %s5813_s7  }
 0x11d   : > { %3679 = vmatprep.subr.msk.bf16.mxu0 %vm2503_vm2, %v3942_v6  ;;  %3680 = vmatprep.subr.msk.bf16.mxu1 %vm2503_vm2, %v3942_v6  ;;  %s3700_s23 = smul.u32 24, %s1272_s13  ;;  %s5818_s13 = sld [smem:[#allocation54_spill]] (%p4640_p11) }
 0x11e   : > { %1983 = vrot.lane.b32.xlu1 %v1709_v21, %s4284_s28  ;;  %v1641_v21 = vshll.u32 %v4882_v17, 16 }
 0x11f   : > { %1967 = vrot.lane.b32.xlu0 %v1613_v16, %s4284_s28  ;;  %v4879_v16 = vld [vmem:[%s4781_s21 + $0xc] sm:$0xff]   ;;  %s4897_s29 = scalar_lea.vmem [#allocation10], %s3700_s23  ;;  %s5814_s21 = sld [smem:[#allocation15_spill]] }
 0x120   : > { %3640 = vmatpush3.bf16.msra.mxu0 %v2505_v8  ;;  %3678 = vmatpush3.bf16.msra.mxu1 %v2505_v8  ;;  %v1737_v19 = vshll.u32 %v4879_v16, 16  ;;  %v1735_v23 = vshrl.u32 %v4879_v16, 16  ;;  %v1643_v28 = vrot.slane %v1641_v21, 1  ;;  %v1851_v36 = vrot.slane %v4879_v16, 1 }
 0x122   : > { %1985 = vrot.lane.b32.xlu1 %v4791_v41, %s4284_s28  ;;  %v1739_v25 = vrot.slane %v1737_v19, 1  ;;  %v1644_v32 = vor.u32 %v1643_v28, %v1639_v27  ;;  %v3936_v28 = vld [vmem:[%s4802_s22 + $0x14] ss:$0 sps:$4 sm:$0x11]  }
 0x123   : > { %1969 = vrot.lane.b32.xlu0 %v4794_v43, %s4284_s28 }
 0x124   : > { %v1740_v30 = vor.u32 %v1739_v25, %v1735_v23  ;;  %v1649_v35 = vsel %vm1589_vm1, %v1644_v32, %v1648_v33  ;;  %v4983_v23 = vld [vmem:[%s4802_s22 + $0xc] sm:$0xff]   ;;  %v1665_v32 = vshll.u32 %v4988_v26, 16 }
 0x125   : > { %s1279_s5 = sand.u32 1, %s5814_s21   ;;  %v1761_v29 = vshll.u32 %v4983_v23, 16 }
 0x126   : > { %2021 = vrot.lane.b32.xlu1 %v4741_v61, %s4285_s17  ;;  %v1730_v61 = vshll.u32 %v3924_v54, 16  ;;  %v1745_v34 = vsel %vm1589_vm1, %v1740_v30, %v1744_v31  ;;  %s3701_s19 = smul.u32 24, %s1279_s5  ;;  %v3937_v31 = vld [vmem:[%s4802_s22 + $0x8] ss:$0 sps:$4 sm:$0x11]   ;;  %v1667_v39 = vrot.slane %v1665_v32, 1 }
 0x127   : > { %2005 = vrot.lane.b32.xlu0 %v4749_v5, %s4285_s17  ;;  %v1636_v5 = vrot.slane %v1634_v0, 1 }
 0x128   : > { %v1732_v3 = vrot.slane %v1730_v61, 1  ;;  %s4934_s7 = scalar_lea.vmem [#allocation11], %s3701_s19  ;;  %v1756_v61 = vrot.slane %v1754_v56, 1 }
 0x129   : > { %v1637_v9 = vsel %vm1589_vm1, %v1632_v4, %v1636_v5 }
 0x12a   : > { %2023 = vrot.lane.b32.xlu1 %v4809_v50, %s4285_s17  ;;  %v1733_v7 = vsel %vm1589_vm1, %v1728_v2, %v1732_v3 }
 0x12b   : > { %2007 = vrot.lane.b32.xlu0 %v4815_v52, %s4285_s17 }
 0x12e   : > { %2063 = vrot.lane.b32.xlu1 %v4760_v22, %s4286_s25 }
 0x12f   : > { %2047 = vrot.lane.b32.xlu0 %v4762_v24, %s4286_s25 }
 0x132   : > { %2065 = vrot.lane.b32.xlu1 %v4812_v51, %s4286_s25 }
 0x133   : > { %2049 = vrot.lane.b32.xlu0 %v4818_v53, %s4286_s25 }
 0x136   : > { %2125 = vrot.lane.b32.xlu1 %v4791_v41, %s4287_s12 }
 0x137   : > { %2109 = vrot.lane.b32.xlu0 %v4794_v43, %s4287_s12 }
 0x13a   : > { %2127 = vrot.lane.b32.xlu1 %v1733_v7, %s4287_s12 }
 0x13b   : > { %2111 = vrot.lane.b32.xlu0 %v1637_v9, %s4287_s12 }
 0x13e   : > { %2163 = vrot.lane.b32.xlu1 %v4809_v50, %s4288_s30 }
 0x13f   : > { %2147 = vrot.lane.b32.xlu0 %v4815_v52, %s4288_s30 }
 0x142   : > { %1802 = vrot.lane.b32.xlu1 %v4791_v41, %s4282_s1  ;;  %v1853_v41 = vsel %vm1814_vm0, %v1851_v36, %v1852_v37  ;;  %v1766_v36 = vshll.u32 %v3936_v28, 16 }
 0x143   : > { %1786 = vrot.lane.b32.xlu0 %v4794_v43, %s4282_s1  ;;  %v4915_v43 = vld [vmem:[%s4787_s2 + $0xc] sm:$0xff]  }
 0x144   : > { %v1749_v49 = vshll.u32 %v4915_v43, 16  ;;  %v1747_v54 = vshrl.u32 %v4915_v43, 16  ;;  %v1854_v6 = vrot.slane %v4915_v43, 1 }
 0x146   : > { %2165 = vrot.lane.b32.xlu1 %v1850_v14, %s4288_s30  ;;  %v1751_v55 = vrot.slane %v1749_v49, 1  ;;  %v1768_v49 = vrot.slane %v1766_v36, 1 }
 0x147   : > { %2149 = vrot.lane.b32.xlu0 %v1826_v15, %s4288_s30 }
 0x148   : > { %v1752_v60 = vor.u32 %v1751_v55, %v1747_v54 }
 0x14a   : > { %1804 = vrot.lane.b32.xlu1 %v1733_v7, %s4282_s1  ;;  %v1757_v1 = vsel %vm1589_vm1, %v1752_v60, %v1756_v61  ;;  %v1857_v60 = vrot.slane %v4983_v23, 1  ;;  %v1858_v61 = vrot.slane %v3936_v28, 1 }
 0x14b   : > { %1788 = vrot.lane.b32.xlu0 %v1637_v9, %s4282_s1 }
 0x14e   : > { %1883 = vrot.lane.b32.xlu1 %v4809_v50, %s4281_s0  ;;  %v3933_v50 = vld [vmem:[%s4787_s2 + $0x8] ss:$0 sps:$4 sm:$0x11]  }
 0x14f   : > { %1867 = vrot.lane.b32.xlu0 %v4815_v52, %s4281_s0  ;;  %v1653_v52 = vshll.u32 %v4919_v45, 16  ;;  %v1658_v59 = vshll.u32 %v3933_v50, 16  ;;  %v1831_v10 = vrot.slane %v3933_v50, 1 }
 0x151   : > { %v1655_v58 = vrot.slane %v1653_v52, 1  ;;  %v1660_v63 = vrot.slane %v1658_v59, 1  ;;  %v1668_v52 = vor.u32 %v1667_v39, %v1663_v38 }
 0x152   : > { %1885 = vrot.lane.b32.xlu1 %v1850_v14, %s4281_s0 }
 0x153   : > { %1869 = vrot.lane.b32.xlu0 %v1826_v15, %s4281_s0  ;;  %v1656_v62 = vor.u32 %v1655_v58, %v1651_v57 }
 0x155   : > { %v1661_v2 = vsel %vm1589_vm1, %v1656_v62, %v1660_v63  ;;  %v1833_v63 = vrot.slane %v4988_v26, 1 }
 0x156   : > { %1925 = vrot.lane.b32.xlu1 %v4812_v51, %s4283_s10 }
 0x157   : > { %1909 = vrot.lane.b32.xlu0 %v4818_v53, %s4283_s10 }
 0x15a   : > { %1927 = vrot.lane.b32.xlu1 %v4879_v16, %s4283_s10 }
 0x15b   : > { %1911 = vrot.lane.b32.xlu0 %v4882_v17, %s4283_s10 }
 0x15e   : > { %1987 = vrot.lane.b32.xlu1 %v1733_v7, %s4284_s28  ;;  %v1855_v7 = vrot.slane %v3932_v47, 1 }
 0x15f   : > { %1971 = vrot.lane.b32.xlu0 %v1637_v9, %s4284_s28  ;;  %v1830_v9 = vrot.slane %v4919_v45, 1 }
 0x160   : > { %v1856_v12 = vsel %vm1814_vm0, %v1854_v6, %v1855_v7  ;;  %v5036_v6 = vld [vmem:[%s4841_s3 + $0xc] sm:$0xff]   ;;  %v5040_v7 = vsel %vm1814_vm0, %v1857_v60, %v1858_v61 }
 0x161   : > { %v1771_v39 = vshrl.u32 %v5036_v6, 16 }
 0x162   : > { %1989 = vrot.lane.b32.xlu1 %v1745_v34, %s4284_s28 }
 0x163   : > { %1973 = vrot.lane.b32.xlu0 %v1649_v35, %s4284_s28 }
 0x166   : > { %2025 = vrot.lane.b32.xlu1 %v1850_v14, %s4285_s17  ;;  %v1832_v14 = vsel %vm1814_vm0, %v1830_v9, %v1831_v10 }
 0x167   : > { %2009 = vrot.lane.b32.xlu0 %v1826_v15, %s4285_s17 }
 0x16a   : > { %2027 = vrot.lane.b32.xlu1 %v1853_v41, %s4285_s17 }
 0x16b   : > { %2011 = vrot.lane.b32.xlu0 %v1829_v44, %s4285_s17 }
 0x16e   : > { %2067 = vrot.lane.b32.xlu1 %v4879_v16, %s4286_s25 }
 0x16f   : > { %2051 = vrot.lane.b32.xlu0 %v4882_v17, %s4286_s25 }
 0x172   : > { %2069 = vrot.lane.b32.xlu1 %v4915_v43, %s4286_s25 }
 0x173   : > { %2053 = vrot.lane.b32.xlu0 %v4919_v45, %s4286_s25 }
 0x176   : > { %2129 = vrot.lane.b32.xlu1 %v1745_v34, %s4287_s12 }
 0x177   : > { %2113 = vrot.lane.b32.xlu0 %v1649_v35, %s4287_s12 }
 0x178   : > { %v4942_v0 = vpop.permute.xlu1 %1879 }
 0x179   : > { %v4946_v3 = vpop.permute.xlu0 %1863 }
 0x17a   : > { %2131 = vrot.lane.b32.xlu1 %v1757_v1, %s4287_s12 }
 0x17b   : > { %2115 = vrot.lane.b32.xlu0 %v1661_v2, %s4287_s12 }
 0x17c   : > { %v4950_v4 = vpop.permute.xlu1 %1881 }
 0x17d   : > { %v4952_v5 = vpop.permute.xlu0 %1865 }
 0x17e   : > { %2167 = vrot.lane.b32.xlu1 %v1853_v41, %s4288_s30 }
 0x17f   : > { %2151 = vrot.lane.b32.xlu0 %v1829_v44, %s4288_s30 }
 0x180   : > { %v4957_v8 = vpop.permute.xlu1 %1784 }
 0x181   : > { %v4960_v11 = vpop.permute.xlu0 %1782 }
 0x182   : > { %1806 = vrot.lane.b32.xlu1 %v1745_v34, %s4282_s1  ;;  %v1759_v34 = vshrl.u32 %v4983_v23, 16 }
 0x183   : > { %1790 = vrot.lane.b32.xlu0 %v1649_v35, %s4282_s1  ;;  %v1763_v35 = vrot.slane %v1761_v29, 1  ;;  %v5048_v29 = vld [vmem:[%s4841_s3] sm:$0xff]  }
 0x184   : > { %v4965_v13 = vpop.permute.xlu1 %1800 }
 0x185   : > { %v1799_v15 = vpop.permute.xlu0 %1798  ;;  %v1764_v47 = vor.u32 %v1763_v35, %v1759_v34  ;;  %v1677_v35 = vshll.u32 %v5048_v29, 16 }
 0x186   : > { %2169 = vrot.lane.b32.xlu1 %v1856_v12, %s4288_s30  ;;  %v2197_v9 = vsel %vm2179_vm3, %v4719_v40, %v1799_v15  ;;  %v1773_v40 = vshll.u32 %v5036_v6, 16 }
 0x187   : > { %2153 = vrot.lane.b32.xlu0 %v1832_v14, %s4288_s30  ;;  %v5019_v56 = vsel %vm1589_vm1, %v1764_v47, %v1768_v49  ;;  %v2230_v15 = vsel %vm2212_vm4, %v2197_v9, %v4942_v0  ;;  %v1679_v61 = vrot.slane %v1677_v35, 1 }
 0x188   : > { %v4970_v18 = vpop.permute.xlu1 %1921 }
 0x189   : > { %v4972_v19 = vpop.permute.xlu0 %1905 }
 0x18a   : > { %1808 = vrot.lane.b32.xlu1 %v1757_v1, %s4282_s1 }
 0x18b   : > { %1792 = vrot.lane.b32.xlu0 %v1661_v2, %s4282_s1 }
 0x18c   : > { %v4976_v20 = vpop.permute.xlu1 %1923 }
 0x18d   : > { %v4978_v21 = vpop.permute.xlu0 %1907 }
 0x18e   : > { %1887 = vrot.lane.b32.xlu1 %v1853_v41, %s4281_s0  ;;  %v1670_v41 = vshll.u32 %v3937_v31, 16 }
 0x18f   : > { %1871 = vrot.lane.b32.xlu0 %v1829_v44, %s4281_s0 }
 0x190   : > { %v4985_v25 = vpop.permute.xlu1 %1983  ;;  %v1672_v54 = vrot.slane %v1670_v41, 1 }
 0x191   : > { %v4990_v27 = vpop.permute.xlu0 %1967 }
 0x192   : > { %1889 = vrot.lane.b32.xlu1 %v1856_v12, %s4281_s0  ;;  %v5022_v58 = vsel %vm1589_vm1, %v1668_v52, %v1672_v54 }
 0x193   : > { %1873 = vrot.lane.b32.xlu0 %v1832_v14, %s4281_s0 }
 0x194   : > { %v4996_v30 = vpop.permute.xlu1 %1985 }
 0x195   : > { %v5000_v33 = vpop.permute.xlu0 %1969 }
 0x196   : > { %1929 = vrot.lane.b32.xlu1 %v4915_v43, %s4283_s10 }
 0x197   : > { %1913 = vrot.lane.b32.xlu0 %v4919_v45, %s4283_s10 }
 0x198   : > { %v2022_v37 = vpop.permute.xlu1 %2021 }
 0x199   : > { %v2006_v44 = vpop.permute.xlu0 %2005 }
 0x19a   : > { %1931 = vrot.lane.b32.xlu1 %v4983_v23, %s4283_s10 }
 0x19b   : > { %1915 = vrot.lane.b32.xlu0 %v4988_v26, %s4283_s10 }
 0x19c   : > { %v5012_v50 = vpop.permute.xlu1 %2023 }
 0x19d   : > { %v5014_v55 = vpop.permute.xlu0 %2007 }
 0x19e   : > { %1991 = vrot.lane.b32.xlu1 %v1757_v1, %s4284_s28  ;;  %v1834_v1 = vrot.slane %v3937_v31, 1  ;;  %v5056_v31 = vld [vmem:[%s4841_s3 + $0x14] ss:$0 sps:$4 sm:$0x11]  }
 0x19f   : > { %1975 = vrot.lane.b32.xlu0 %v1661_v2, %s4284_s28  ;;  %v1778_v47 = vshll.u32 %v5056_v31, 16 }
 0x1a0   : > { %v2064_v57 = vpop.permute.xlu1 %2063  ;;  %v5045_v28 = vsel %vm1814_vm0, %v1833_v63, %v1834_v1 }
 0x1a1   : > { %v2048_v59 = vpop.permute.xlu0 %2047 }
 0x1a2   : > { %1993 = vrot.lane.b32.xlu1 %v5019_v56, %s4284_s28 }
 0x1a3   : > { %1977 = vrot.lane.b32.xlu0 %v5022_v58, %s4284_s28 }
 0x1a4   : > { %v5029_v62 = vpop.permute.xlu1 %2065 }
 0x1a5   : > { %v5032_v2 = vpop.permute.xlu0 %2049 }
 0x1a6   : > { %2029 = vrot.lane.b32.xlu1 %v1856_v12, %s4285_s17  ;;  %v2181_v12 = vsel %vm2179_vm3, %v4721_v42, %v4960_v11  ;;  %v5064_v42 = vld [vmem:[%s4841_s3 + $0x8] ss:$0 sps:$4 sm:$0x11]   ;;  %v2263_v11 = vsel %vm2245_vm5, %v2230_v15, %v4970_v18 }
 0x1a7   : > { %2013 = vrot.lane.b32.xlu0 %v1832_v14, %s4285_s17  ;;  %v2214_v32 = vsel %vm2212_vm4, %v2181_v12, %v4946_v3  ;;  %v2296_v36 = vsel %vm2278_vm6, %v2263_v11, %v4985_v25  ;;  %v1775_v3 = vrot.slane %v1773_v40, 1  ;;  %v1675_v25 = vshrl.u32 %v5048_v29, 16 }
 0x1a8   : > { %v2126_v10 = vpop.permute.xlu1 %2125  ;;  %v2247_v0 = vsel %vm2245_vm5, %v2214_v32, %v4972_v19  ;;  %v2329_v41 = vsel %vm2311_vm7, %v2296_v36, %v2022_v37  ;;  %v1682_v52 = vshll.u32 %v5064_v42, 16 }
 0x1a9   : > { %v2110_v14 = vpop.permute.xlu0 %2109  ;;  %v2280_v18 = vsel %vm2278_vm6, %v2247_v0, %v4990_v27  ;;  %v2362_v49 = vsel %vm2344_vm8, %v2329_v41, %v2064_v57  ;;  %v2199_v27 = vsel %vm2179_vm3, %v4724_v46, %v4965_v13  ;;  %v1680_v12 = vor.u32 %v1679_v61, %v1675_v25  ;;  %v3947_v61 = vld [vmem:[%s4897_s29 + $0x14] ss:$0 sps:$4 sm:$0x11]  }
 0x1aa   : > { %2031 = vrot.lane.b32.xlu1 %v5040_v7, %s4285_s17  ;;  %v2313_v19 = vsel %vm2311_vm7, %v2280_v18, %v2006_v44  ;;  %v2395_v54 = vsel %vm2377_vm9, %v2362_v49, %v2126_v10  ;;  %v2183_v44 = vsel %vm2179_vm3, %v4727_v48, %v4957_v8  ;;  %v2232_v13 = vsel %vm2212_vm4, %v2199_v27, %v4950_v4  ;;  %v5194_v27 = vld [vmem:[%s4897_s29 + $0xc] sm:$0xff]  }
 0x1ab   : > { %2015 = vrot.lane.b32.xlu0 %v5045_v28, %s4285_s17  ;;  %v2346_v37 = vsel %vm2344_vm8, %v2313_v19, %v2048_v59  ;;  %v1776_v48 = vor.u32 %v1775_v3, %v1771_v39  ;;  %v1780_v8 = vrot.slane %v1778_v47, 1  ;;  %v2265_v59 = vsel %vm2245_vm5, %v2232_v13, %v4976_v20 }
 0x1ac   : > { %v2128_v34 = vpop.permute.xlu1 %2127  ;;  %v2379_v57 = vsel %vm2377_vm9, %v2346_v37, %v2110_v14  ;;  %v2216_v9 = vsel %vm2212_vm4, %v2183_v44, %v4952_v5  ;;  %v1684_v14 = vrot.slane %v1682_v52, 1  ;;  %v2298_v40 = vsel %vm2278_vm6, %v2265_v59, %v4996_v30 }
 0x1ad   : > { %v2112_v38 = vpop.permute.xlu0 %2111  ;;  %v2249_v4 = vsel %vm2245_vm5, %v2216_v9, %v4978_v21  ;;  %v2331_v20 = vsel %vm2311_vm7, %v2298_v40, %v5012_v50  ;;  %v5132_v30 = vsel %vm1589_vm1, %v1776_v48, %v1780_v8  ;;  %v1861_v39 = vrot.slane %v5056_v31, 1 }
 0x1ae   : > { %2071 = vrot.lane.b32.xlu1 %v4983_v23, %s4286_s25  ;;  %v2282_v11 = vsel %vm2278_vm6, %v2249_v4, %v5000_v33  ;;  %v2364_v21 = vsel %vm2344_vm8, %v2331_v20, %v5029_v62  ;;  %v5138_v35 = vsel %vm1589_vm1, %v1680_v12, %v1684_v14  ;;  %v1836_v41 = vrot.slane %v5048_v29, 1 }
 0x1af   : > { %2055 = vrot.lane.b32.xlu0 %v4988_v26, %s4286_s25  ;;  %v2315_v5 = vsel %vm2311_vm7, %v2282_v11, %v5014_v55  ;;  %v2397_v50 = vsel %vm2377_vm9, %v2364_v21, %v2128_v34  ;;  %v1837_v3 = vrot.slane %v5064_v42, 1  ;;  %v1958_v44 = vshll.u32 %v5194_v27, 16 }
 0x1b0   : > { %v2164_v60 = vpop.permute.xlu1 %2163  ;;  %v2348_v33 = vsel %vm2344_vm8, %v2315_v5, %v5032_v2  ;;  %v1963_v13 = vshll.u32 %v3947_v61, 16 }
 0x1b1   : > { %v2148_v63 = vpop.permute.xlu0 %2147  ;;  %v2428_v1 = vsel %vm2410_vm10, %v2395_v54, %v2164_v60  ;;  %v2381_v55 = vsel %vm2377_vm9, %v2348_v33, %v2112_v38  ;;  %v1860_v38 = vrot.slane %v5036_v6, 1  ;;  %v1838_v31 = vsel %vm1814_vm0, %v1836_v41, %v1837_v3  ;;  %v5199_v54 = vld [vmem:[%s4897_s29] sm:$0xff]  }
 0x1b2   : > { %2073 = vrot.lane.b32.xlu1 %v5036_v6, %s4286_s25  ;;  %v2412_v46 = vsel %vm2410_vm10, %v2379_v57, %v2148_v63  ;;  %3657 = vmatprep.mubr.msk.bf16.mxu1 %vm2470_vm11, %v2428_v1  ;;  %v1956_v1 = vshrl.u32 %v5194_v27, 16  ;;  %v1944_v8 = vshrl.u32 %v5199_v54, 16  ;;  %v1965_v4 = vrot.slane %v1963_v13, 1  ;;  %v5282_v13 = vld [vmem:[%s4934_s7 + $0x8] ss:$0 sps:$4 sm:$0x11]  }
 0x1b3   : > { %2057 = vrot.lane.b32.xlu0 %v5048_v29, %s4286_s25  ;;  %3641 = vmatprep.mubr.msk.bf16.mxu0 %vm2470_vm11, %v2412_v46  ;;  %v1862_v19 = vsel %vm1814_vm0, %v1860_v38, %v1861_v39  ;;  %v1960_v46 = vrot.slane %v1958_v44, 1  ;;  %v5249_v38 = vld [vmem:[%s4934_s7 + $0xc] sm:$0xff]  }
 0x1b4   : > { %v5111_v10 = vpop.permute.xlu1 %1802 }
 0x1b5   : > { %v5117_v15 = vpop.permute.xlu0 %1786  ;;  %v1961_v14 = vor.u32 %v1960_v46, %v1956_v1  ;;  %v5275_v1 = vld [vmem:[%s4934_s7 + $0x14] ss:$0 sps:$4 sm:$0x11]  }
 0x1b6   : > { %2133 = vrot.lane.b32.xlu1 %v5019_v56, %s4287_s12 }
 0x1b7   : > { %2117 = vrot.lane.b32.xlu0 %v5022_v58, %s4287_s12  ;;  %v5232_v21 = vsel %vm1589_vm1, %v1961_v14, %v1965_v4 }
 0x1b8   : > { %v2166_v32 = vpop.permute.xlu1 %2165 }
 0x1b9   : > { %v2430_v0 = vsel %vm2410_vm10, %v2397_v50, %v2166_v32  ;;  %v2150_v62 = vpop.permute.xlu0 %2149 }
 0x1ba   : > { %v2414_v36 = vsel %vm2410_vm10, %v2381_v55, %v2150_v62  ;;  %2135 = vrot.lane.b32.xlu1 %v5132_v30, %s4287_s12  ;;  %3658 = vmatmul.mubr.msk.bf16.vlgmr.msra.gmra.mrb[0].mxu1 %vm2470_vm11, %v2430_v0  ;;  %v2003_v55 = vrot.slane %v3947_v61, 1  ;;  %v5259_v61 = vld [vmem:[%s4934_s7] sm:$0xff]  }
 0x1bb   : > { %2119 = vrot.lane.b32.xlu0 %v5138_v35, %s4287_s12  ;;  %3642 = vmatmul.mubr.msk.bf16.vlgmr.msra.gmra.mrb[0].mxu0 %vm2470_vm11, %v2414_v36 }
 0x1bc   : > { %v5149_v2 = vpop.permute.xlu1 %1804 }
 0x1bd   : > { %v5151_v34 = vpop.permute.xlu0 %1788 }
 0x1be   : > { %2171 = vrot.lane.b32.xlu1 %v5040_v7, %s4288_s30 }
 0x1bf   : > { %2155 = vrot.lane.b32.xlu0 %v5045_v28, %s4288_s30 }
 0x1c0   : > { %v5159_v18 = vpop.permute.xlu1 %1883 }
 0x1c1   : > { %v5163_v47 = vpop.permute.xlu0 %1867 }
 0x1c2   : > { %1810 = vrot.lane.b32.xlu1 %v5019_v56, %s4282_s1 }
 0x1c3   : > { %1794 = vrot.lane.b32.xlu0 %v5022_v58, %s4282_s1 }
 0x1c4   : > { %v5170_v49 = vpop.permute.xlu1 %1885 }
 0x1c5   : > { %v5173_v25 = vpop.permute.xlu0 %1869 }
 0x1c6   : > { %2173 = vrot.lane.b32.xlu1 %v1862_v19, %s4288_s30 }
 0x1c7   : > { %2157 = vrot.lane.b32.xlu0 %v1838_v31, %s4288_s30 }
 0x1c8   : > { %v5177_v42 = vpop.permute.xlu1 %1925 }
 0x1c9   : > { %v5179_v56 = vpop.permute.xlu0 %1909 }
 0x1ca   : > { %1812 = vrot.lane.b32.xlu1 %v5132_v30, %s4282_s1 }
 0x1cb   : > { %1796 = vrot.lane.b32.xlu0 %v5138_v35, %s4282_s1 }
 0x1cc   : > { %v5185_v58 = vpop.permute.xlu1 %1927 }
 0x1cd   : > { %v5187_v52 = vpop.permute.xlu0 %1911 }
 0x1ce   : > { %1891 = vrot.lane.b32.xlu1 %v5040_v7, %s4281_s0  ;;  %v3948_v7 = vld [vmem:[%s4897_s29 + $0x8] ss:$0 sps:$4 sm:$0x11]  }
 0x1cf   : > { %1875 = vrot.lane.b32.xlu0 %v5045_v28, %s4281_s0  ;;  %v1946_v28 = vshll.u32 %v5199_v54, 16  ;;  %v1951_v9 = vshll.u32 %v3948_v7, 16  ;;  %v2000_v62 = vrot.slane %v3948_v7, 1  ;;  %v2201_v7 = vsel %vm2179_vm3, %v4760_v22, %v5111_v10 }
 0x1d0   : > { %v5196_v37 = vpop.permute.xlu1 %1987 }
 0x1d1   : > { %v5201_v60 = vpop.permute.xlu0 %1971  ;;  %v1948_v59 = vrot.slane %v1946_v28, 1  ;;  %v1953_v20 = vrot.slane %v1951_v9, 1  ;;  %v2234_v28 = vsel %vm2212_vm4, %v2201_v7, %v5159_v18 }
 0x1d2   : > { %1893 = vrot.lane.b32.xlu1 %v1862_v19, %s4281_s0  ;;  %v2267_v10 = vsel %vm2245_vm5, %v2234_v28, %v5177_v42  ;;  %v2098_v42 = vshrl.u32 %v5249_v38, 16 }
 0x1d3   : > { %1877 = vrot.lane.b32.xlu0 %v1838_v31, %s4281_s0  ;;  %v1949_v11 = vor.u32 %v1948_v59, %v1944_v8  ;;  %v2088_v8 = vshll.u32 %v5259_v61, 16 }
 0x1d4   : > { %v5207_v57 = vpop.permute.xlu1 %1989 }
 0x1d5   : > { %v5211_v63 = vpop.permute.xlu0 %1973  ;;  %v5235_v50 = vsel %vm1589_vm1, %v1949_v11, %v1953_v20  ;;  %v2093_v20 = vshll.u32 %v5282_v13, 16 }
 0x1d6   : > { %1933 = vrot.lane.b32.xlu1 %v5036_v6, %s4283_s10 }
 0x1d7   : > { %1917 = vrot.lane.b32.xlu0 %v5048_v29, %s4283_s10 }
 0x1d8   : > { %v2026_v48 = vpop.permute.xlu1 %2025 }
 0x1d9   : > { %v2010_v12 = vpop.permute.xlu0 %2009 }
 0x1da   : > { %1935 = vrot.lane.b32.xlu1 %v5194_v27, %s4283_s10 }
 0x1db   : > { %1919 = vrot.lane.b32.xlu0 %v5199_v54, %s4283_s10  ;;  %s5815_s10 = sld [smem:[#allocation53_spill]] }
 0x1dc   : > { %v5223_v40 = vpop.permute.xlu1 %2027 }
 0x1dd   : > { %v5225_v5 = vpop.permute.xlu0 %2011 }
 0x1de   : > { %1995 = vrot.lane.b32.xlu1 %v5132_v30, %s4284_s28  ;;  %v2002_v30 = vrot.slane %v5194_v27, 1 }
 0x1df   : > { %1979 = vrot.lane.b32.xlu0 %v5138_v35, %s4284_s28  ;;  %v1999_v35 = vrot.slane %v5199_v54, 1 }
 0x1e0   : > { %v2068_v33 = vpop.permute.xlu1 %2067  ;;  %v5253_v39 = vsel %vm1814_vm0, %v2002_v30, %v2003_v55 }
 0x1e1   : > { %v2052_v32 = vpop.permute.xlu0 %2051  ;;  %v5256_v3 = vsel %vm1814_vm0, %v1999_v35, %v2000_v62 }
 0x1e2   : > { %1997 = vrot.lane.b32.xlu1 %v5232_v21, %s4284_s28 }
 0x1e3   : > { %1981 = vrot.lane.b32.xlu0 %v5235_v50, %s4284_s28  ;;  %s5816_s28 = sld [smem:[#allocation13_spill]] }
 0x1e4   : > { %v5242_v0 = vpop.permute.xlu1 %2069 }
 0x1e5   : > { %v5245_v36 = vpop.permute.xlu0 %2053 }
 0x1e6   : > { %2033 = vrot.lane.b32.xlu1 %v1862_v19, %s4285_s17  ;;  %v2100_v19 = vshll.u32 %v5249_v38, 16 }
 0x1e7   : > { %2017 = vrot.lane.b32.xlu0 %v1838_v31, %s4285_s17  ;;  %v2185_v31 = vsel %vm2179_vm3, %v4762_v24, %v5117_v15  ;;  %v2300_v15 = vsel %vm2278_vm6, %v2267_v10, %v5196_v37  ;;  %v2086_v37 = vshrl.u32 %v5259_v61, 16 }
 0x1e8   : > { %v2130_v41 = vpop.permute.xlu1 %2129  ;;  %v2218_v22 = vsel %vm2212_vm4, %v2185_v31, %v5163_v47  ;;  %v2333_v47 = vsel %vm2311_vm7, %v2300_v15, %v2026_v48  ;;  %v2102_v9 = vrot.slane %v2100_v19, 1  ;;  %v2095_v19 = vrot.slane %v2093_v20, 1 }
 0x1e9   : > { %v2114_v44 = vpop.permute.xlu0 %2113  ;;  %v2251_v24 = vsel %vm2245_vm5, %v2218_v22, %v5179_v56  ;;  %v2366_v4 = vsel %vm2344_vm8, %v2333_v47, %v2068_v33  ;;  %v2105_v56 = vshll.u32 %v5275_v1, 16  ;;  %s1359_s2 = sand.u32 1, %s5816_s28  }
 0x1ea   : > { %2035 = vrot.lane.b32.xlu1 %v5253_v39, %s4285_s17  ;;  %v2284_v59 = vsel %vm2278_vm6, %v2251_v24, %v5201_v60  ;;  %v2399_v48 = vsel %vm2377_vm9, %v2366_v4, %v2130_v41  ;;  %v2142_v24 = vrot.slane %v5282_v13, 1  ;;  %s3515_s22 = sshll.u32 %s1359_s2, 8 }
 0x1eb   : > { %2019 = vrot.lane.b32.xlu0 %v5256_v3, %s4285_s17  ;;  %v2317_v14 = vsel %vm2311_vm7, %v2284_v59, %v2010_v12  ;;  %s5468_s17 = scalar_lea.vmem [#allocation12], %s3515_s22 }
 0x1ec   : > { %v2132_v46 = vpop.permute.xlu1 %2131  ;;  %v2350_v60 = vsel %vm2344_vm8, %v2317_v14, %v2052_v32  ;;  %v2187_v32 = vsel %vm2179_vm3, %v4818_v53, %v5151_v34 }
 0x1ed   : > { %v2116_v18 = vpop.permute.xlu0 %2115  ;;  %v2383_v30 = vsel %vm2377_vm9, %v2350_v60, %v2114_v44  ;;  %v2220_v62 = vsel %vm2212_vm4, %v2187_v32, %v5173_v25 }
 0x1ee   : > { %2075 = vrot.lane.b32.xlu1 %v5194_v27, %s4286_s25  ;;  %v2090_v27 = vrot.slane %v2088_v8, 1  ;;  %v2253_v53 = vsel %vm2245_vm5, %v2220_v62, %v5187_v52  ;;  %v2141_v8 = vrot.slane %v5259_v61, 1 }
 0x1ef   : > { %2059 = vrot.lane.b32.xlu0 %v5199_v54, %s4286_s25  ;;  %v2203_v54 = vsel %vm2179_vm3, %v4812_v51, %v5149_v2  ;;  %v2103_v51 = vor.u32 %v2102_v9, %v2098_v42  ;;  %v2107_v2 = vrot.slane %v2105_v56, 1  ;;  %v2286_v31 = vsel %vm2278_vm6, %v2253_v53, %v5211_v63 }
 0x1f0   : > { %v2168_v11 = vpop.permute.xlu1 %2167  ;;  %v2236_v35 = vsel %vm2212_vm4, %v2203_v54, %v5170_v49  ;;  %v2091_v7 = vor.u32 %v2090_v27, %v2086_v37  ;;  %v2319_v25 = vsel %vm2311_vm7, %v2286_v31, %v5225_v5  ;;  %v2143_v47 = vsel %vm1814_vm0, %v2141_v8, %v2142_v24 }
 0x1f1   : > { %v2432_v12 = vsel %vm2410_vm10, %v2399_v48, %v2168_v11  ;;  %v2152_v33 = vpop.permute.xlu0 %2151  ;;  %v2269_v41 = vsel %vm2245_vm5, %v2236_v35, %v5185_v58  ;;  %v2108_v52 = vsel %vm1589_vm1, %v2103_v51, %v2107_v2 }
 0x1f2   : > { %v2416_v55 = vsel %vm2410_vm10, %v2383_v30, %v2152_v33  ;;  %2077 = vrot.lane.b32.xlu1 %v5249_v38, %s4286_s25  ;;  %3661 = vmatprep.mubr.msk.bf16.mxu1 %vm2470_vm11, %v2432_v12  ;;  %v2302_v34 = vsel %vm2278_vm6, %v2269_v41, %v5207_v57  ;;  %v2352_v57 = vsel %vm2344_vm8, %v2319_v25, %v5245_v36  ;;  %v2145_v36 = vrot.slane %v5275_v1, 1 }
 0x1f3   : > { %2061 = vrot.lane.b32.xlu0 %v5259_v61, %s4286_s25  ;;  %3645 = vmatprep.mubr.msk.bf16.mxu0 %vm2470_vm11, %v2416_v55  ;;  %v2335_v28 = vsel %vm2311_vm7, %v2302_v34, %v5223_v40  ;;  %v2096_v22 = vsel %vm1589_vm1, %v2091_v7, %v2095_v19  ;;  %s5817_s25 = sld [smem:[#allocation28_spill]] (%p4640_p11) }
 0x1f4   : > { %v1807_v44 = vpop.permute.xlu1 %1806  ;;  %v2368_v58 = vsel %vm2344_vm8, %v2335_v28, %v5242_v0 }
 0x1f5   : > { %v1791_v49 = vpop.permute.xlu0 %1790  ;;  %v2401_v63 = vsel %vm2377_vm9, %v2368_v58, %v2132_v46  ;;  %v2205_v55 = vsel %vm2179_vm3, %v4879_v16, %v1807_v44 }
 0x1f6   : > { %2137 = vrot.lane.b32.xlu1 %v5232_v21, %s4287_s12  ;;  %v2385_v21 = vsel %vm2377_vm9, %v2352_v57, %v2116_v18  ;;  %v2189_v32 = vsel %vm2179_vm3, %v4882_v17, %v1791_v49 }
 0x1f7   : > { %2121 = vrot.lane.b32.xlu0 %v5235_v50, %s4287_s12  ;;  %v2144_v50 = vrot.slane %v5249_v38, 1 }
 0x1f8   : > { %v2170_v40 = vpop.permute.xlu1 %2169 }
 0x1f9   : > { %v2434_v5 = vsel %vm2410_vm10, %v2401_v63, %v2170_v40  ;;  %v2154_v10 = vpop.permute.xlu0 %2153  ;;  %v2146_v18 = vsel %vm1814_vm0, %v2144_v50, %v2145_v36  ;;  %s3615_s3 = sshll.u32 (%p4640_p11), %s5817_s25, 7 }
 0x1fa   : > { %v2418_v0 = vsel %vm2410_vm10, %v2385_v21, %v2154_v10  ;;  %2139 = vrot.lane.b32.xlu1 %v2108_v52, %s4287_s12  ;;  %3662 = vmatmul.mubr.msk.bf16.gmra.mrb[4].mxu1 %vm2470_vm11, %v2434_v5  ;;  %s5538_s23 = scalar_lea.vmem (%p4640_p11), %s5818_s13, %s3615_s3 }
 0x1fb   : > { %2123 = vrot.lane.b32.xlu0 %v2096_v22, %s4287_s12  ;;  %3646 = vmatmul.mubr.msk.bf16.gmra.mrb[4].mxu0 %vm2470_vm11, %v2418_v0 }
 0x1fc   : > { %v1809_v46 = vpop.permute.xlu1 %1808 }
 0x1fd   : > { %v1793_v15 = vpop.permute.xlu0 %1792  ;;  %v2207_v52 = vsel %vm2179_vm3, %v4915_v43, %v1809_v46 }
 0x1fe   : > { %2175 = vrot.lane.b32.xlu1 %v5253_v39, %s4288_s30  ;;  %v2191_v63 = vsel %vm2179_vm3, %v4919_v45, %v1793_v15 }
 0x1ff   : > { %2159 = vrot.lane.b32.xlu0 %v5256_v3, %s4288_s30 }
 0x200   : > { %v1888_v59 = vpop.permute.xlu1 %1887 }
 0x201   : > { %v1872_v38 = vpop.permute.xlu0 %1871  ;;  %v2238_v35 = vsel %vm2212_vm4, %v2205_v55, %v1888_v59 }
 0x202   : > { %2177 = vrot.lane.b32.xlu1 %v2146_v18, %s4288_s30  ;;  %v2222_v51 = vsel %vm2212_vm4, %v2189_v32, %v1872_v38 }
 0x203   : > { %2161 = vrot.lane.b32.xlu0 %v2143_v47, %s4288_s30 }
 0x204   : > { %v1890_v61 = vpop.permute.xlu1 %1889 }
 0x205   : > { %v1874_v1 = vpop.permute.xlu0 %1873  ;;  %v2240_v40 = vsel %vm2212_vm4, %v2207_v52, %v1890_v61 }
 0x206   : > { %v2224_v22 = vsel %vm2212_vm4, %v2191_v63, %v1874_v1 }
 0x208   : > { %v1930_v13 = vpop.permute.xlu1 %1929 }
 0x209   : > { %v1914_v42 = vpop.permute.xlu0 %1913  ;;  %v2271_v2 = vsel %vm2245_vm5, %v2238_v35, %v1930_v13 }
 0x20a   : > { %v2255_v41 = vsel %vm2245_vm5, %v2222_v51, %v1914_v42 }
 0x20c   : > { %v1932_v9 = vpop.permute.xlu1 %1931 }
 0x20d   : > { %v1916_v14 = vpop.permute.xlu0 %1915  ;;  %v2273_v21 = vsel %vm2245_vm5, %v2240_v40, %v1932_v9 }
 0x20e   : > { %v2257_v10 = vsel %vm2245_vm5, %v2224_v22, %v1916_v14 }
 0x210   : > { %v1992_v39 = vpop.permute.xlu1 %1991 }
 0x211   : > { %v1976_v4 = vpop.permute.xlu0 %1975  ;;  %v2304_v7 = vsel %vm2278_vm6, %v2271_v2, %v1992_v39 }
 0x212   : > { %v2288_v53 = vsel %vm2278_vm6, %v2255_v41, %v1976_v4 }
 0x214   : > { %v1994_v56 = vpop.permute.xlu1 %1993 }
 0x215   : > { %v1978_v3 = vpop.permute.xlu0 %1977  ;;  %v2306_v43 = vsel %vm2278_vm6, %v2273_v21, %v1994_v56 }
 0x216   : > { %v2290_v50 = vsel %vm2278_vm6, %v2257_v10, %v1978_v3 }
 0x218   : > { %v2030_v37 = vpop.permute.xlu1 %2029 }
 0x219   : > { %v2014_v60 = vpop.permute.xlu0 %2013  ;;  %v2337_v34 = vsel %vm2311_vm7, %v2304_v7, %v2030_v37 }
 0x21a   : > { %v2321_v16 = vsel %vm2311_vm7, %v2288_v53, %v2014_v60 }
 0x21c   : > { %v2032_v48 = vpop.permute.xlu1 %2031 }
 0x21d   : > { %v2016_v11 = vpop.permute.xlu0 %2015  ;;  %v2339_v36 = vsel %vm2311_vm7, %v2306_v43, %v2032_v48 }
 0x21e   : > { %v2323_v45 = vsel %vm2311_vm7, %v2290_v50, %v2016_v11 }
 0x220   : > { %v2072_v27 = vpop.permute.xlu1 %2071 }
 0x221   : > { %v2056_v20 = vpop.permute.xlu0 %2055  ;;  %v2370_v17 = vsel %vm2344_vm8, %v2337_v34, %v2072_v27 }
 0x222   : > { %v2354_v44 = vsel %vm2344_vm8, %v2321_v16, %v2056_v20 }
 0x224   : > { %v2074_v30 = vpop.permute.xlu1 %2073 }
 0x225   : > { %v2058_v12 = vpop.permute.xlu0 %2057  ;;  %v2372_v46 = vsel %vm2344_vm8, %v2339_v36, %v2074_v30 }
 0x226   : > { %v2356_v8 = vsel %vm2344_vm8, %v2323_v45, %v2058_v12 }
 0x228   : > { %v2134_v33 = vpop.permute.xlu1 %2133 }
 0x229   : > { %v2118_v54 = vpop.permute.xlu0 %2117  ;;  %v2403_v49 = vsel %vm2377_vm9, %v2370_v17, %v2134_v33 }
 0x22a   : > { %v2387_v28 = vsel %vm2377_vm9, %v2354_v44, %v2118_v54 }
 0x22c   : > { %v2136_v62 = vpop.permute.xlu1 %2135 }
 0x22d   : > { %v2120_v19 = vpop.permute.xlu0 %2119  ;;  %v2405_v24 = vsel %vm2377_vm9, %v2372_v46, %v2136_v62 }
 0x22e   : > { %v2389_v18 = vsel %vm2377_vm9, %v2356_v8, %v2120_v19 }
 0x230   : > { %v2172_v31 = vpop.permute.xlu1 %2171 }
 0x231   : > { %v2436_v25 = vsel %vm2410_vm10, %v2403_v49, %v2172_v31  ;;  %v2156_v58 = vpop.permute.xlu0 %2155 }
 0x232   : > { %v2420_v57 = vsel %vm2410_vm10, %v2387_v28, %v2156_v58  ;;  %3665 = vmatprep.mubr.msk.bf16.mxu1 %vm2470_vm11, %v2436_v25 }
 0x233   : > { %3649 = vmatprep.mubr.msk.bf16.mxu0 %vm2470_vm11, %v2420_v57 }
 0x234   : > { %v1811_v5 = vpop.permute.xlu1 %1810 }
 0x235   : > { %v1795_v0 = vpop.permute.xlu0 %1794  ;;  %v2209_v2 = vsel %vm2179_vm3, %v4983_v23, %v1811_v5 }
 0x236   : > { %v2193_v62 = vsel %vm2179_vm3, %v4988_v26, %v1795_v0 }
 0x238   : > { %v2174_v15 = vpop.permute.xlu1 %2173 }
 0x239   : > { %v2438_v59 = vsel %vm2410_vm10, %v2405_v24, %v2174_v15  ;;  %v2158_v47 = vpop.permute.xlu0 %2157 }
 0x23a   : > { %v2422_v38 = vsel %vm2410_vm10, %v2389_v18, %v2158_v47  ;;  %3666 = vmatmul.mubr.msk.bf16.gmra.mrb[8].mxu1 %vm2470_vm11, %v2438_v59  ;;  %v5448_v47 = vld [vmem:[%s5815_s10] ss:$0 sm:$0xff] }
 0x23b   : > { %3650 = vmatmul.mubr.msk.bf16.gmra.mrb[8].mxu0 %vm2470_vm11, %v2422_v38 }
 0x23c   : > { %v1813_v61 = vpop.permute.xlu1 %1812 }
 0x23d   : > { %v1797_v1 = vpop.permute.xlu0 %1796  ;;  %v2211_v44 = vsel %vm2179_vm3, %v5036_v6, %v1813_v61 }
 0x23e   : > { %v2195_v26 = vsel %vm2179_vm3, %v5048_v29, %v1797_v1 }
 0x240   : > { %v1892_v13 = vpop.permute.xlu1 %1891 }
 0x241   : > { %v1876_v42 = vpop.permute.xlu0 %1875  ;;  %v2242_v41 = vsel %vm2212_vm4, %v2209_v2, %v1892_v13 }
 0x242   : > { %v2226_v7 = vsel %vm2212_vm4, %v2193_v62, %v1876_v42 }
 0x244   : > { %v1894_v9 = vpop.permute.xlu1 %1893 }
 0x245   : > { %v1878_v14 = vpop.permute.xlu0 %1877  ;;  %v2244_v31 = vsel %vm2212_vm4, %v2211_v44, %v1894_v9 }
 0x246   : > { %v2228_v58 = vsel %vm2212_vm4, %v2195_v26, %v1878_v14 }
 0x248   : > { %v1934_v39 = vpop.permute.xlu1 %1933 }
 0x249   : > { %v1918_v4 = vpop.permute.xlu0 %1917  ;;  %v2275_v19 = vsel %vm2245_vm5, %v2242_v41, %v1934_v39 }
 0x24a   : > { %v2259_v34 = vsel %vm2245_vm5, %v2226_v7, %v1918_v4 }
 0x24c   : > { %v1936_v56 = vpop.permute.xlu1 %1935 }
 0x24d   : > { %v1920_v3 = vpop.permute.xlu0 %1919  ;;  %v2277_v52 = vsel %vm2245_vm5, %v2244_v31, %v1936_v56 }
 0x24e   : > { %v2261_v40 = vsel %vm2245_vm5, %v2228_v58, %v1920_v3 }
 0x250   : > { %v1996_v37 = vpop.permute.xlu1 %1995 }
 0x251   : > { %v1980_v60 = vpop.permute.xlu0 %1979  ;;  %v2308_v16 = vsel %vm2278_vm6, %v2275_v19, %v1996_v37 }
 0x252   : > { %v2292_v23 = vsel %vm2278_vm6, %v2259_v34, %v1980_v60 }
 0x254   : > { %v1998_v48 = vpop.permute.xlu1 %1997 }
 0x255   : > { %v1982_v11 = vpop.permute.xlu0 %1981  ;;  %v2310_v22 = vsel %vm2278_vm6, %v2277_v52, %v1998_v48 }
 0x256   : > { %v2294_v10 = vsel %vm2278_vm6, %v2261_v40, %v1982_v11 }
 0x258   : > { %v2034_v27 = vpop.permute.xlu1 %2033 }
 0x259   : > { %v2018_v20 = vpop.permute.xlu0 %2017  ;;  %v2341_v49 = vsel %vm2311_vm7, %v2308_v16, %v2034_v27 }
 0x25a   : > { %v2325_v28 = vsel %vm2311_vm7, %v2292_v23, %v2018_v20 }
 0x25c   : > { %v2036_v30 = vpop.permute.xlu1 %2035 }
 0x25d   : > { %v2020_v12 = vpop.permute.xlu0 %2019  ;;  %v2343_v43 = vsel %vm2311_vm7, %v2310_v22, %v2036_v30 }
 0x25e   : > { %v2327_v50 = vsel %vm2311_vm7, %v2294_v10, %v2020_v12 }
 0x260   : > { %v2076_v33 = vpop.permute.xlu1 %2075 }
 0x261   : > { %v2060_v54 = vpop.permute.xlu0 %2059  ;;  %v2374_v25 = vsel %vm2344_vm8, %v2341_v49, %v2076_v33 }
 0x262   : > { %v2358_v57 = vsel %vm2344_vm8, %v2325_v28, %v2060_v54 }
 0x264   : > { %v2078_v55 = vpop.permute.xlu1 %2077 }
 0x265   : > { %v2062_v32 = vpop.permute.xlu0 %2061  ;;  %v2376_v36 = vsel %vm2344_vm8, %v2343_v43, %v2078_v55 }
 0x266   : > { %v2360_v45 = vsel %vm2344_vm8, %v2327_v50, %v2062_v32 }
 0x268   : > { %v2138_v35 = vpop.permute.xlu1 %2137 }
 0x269   : > { %v2122_v51 = vpop.permute.xlu0 %2121  ;;  %v2407_v6 = vsel %vm2377_vm9, %v2374_v25, %v2138_v35 }
 0x26a   : > { %v2391_v29 = vsel %vm2377_vm9, %v2358_v57, %v2122_v51 }
 0x26c   : > { %v2140_v53 = vpop.permute.xlu1 %2139 }
 0x26d   : > { %v2124_v17 = vpop.permute.xlu0 %2123  ;;  %v2409_v46 = vsel %vm2377_vm9, %v2376_v36, %v2140_v53 }
 0x26e   : > { %v2393_v24 = vsel %vm2377_vm9, %v2360_v45, %v2124_v17 }
 0x270   : > { %v2176_v63 = vpop.permute.xlu1 %2175 }
 0x271   : > { %v2440_v21 = vsel %vm2410_vm10, %v2407_v6, %v2176_v63  ;;  %v2160_v5 = vpop.permute.xlu0 %2159 }
 0x272   : > { %v2424_v0 = vsel %vm2410_vm10, %v2391_v29, %v2160_v5  ;;  %3669 = vmatprep.mubr.msk.bf16.mxu1 %vm2470_vm11, %v2440_v21 }
 0x273   : > { %3653 = vmatprep.mubr.msk.bf16.mxu0 %vm2470_vm11, %v2424_v0 }
 0x274   : > { %v2178_v8 = vpop.permute.xlu1 %2177 }
 0x275   : > { %v2442_v15 = vsel %vm2410_vm10, %v2409_v46, %v2178_v8  ;;  %v2162_v18 = vpop.permute.xlu0 %2161 }
 0x276   : > { %v2426_v59 = vsel %vm2410_vm10, %v2393_v24, %v2162_v18  ;;  %3670 = vmatmul.mubr.msk.bf16.gmra.mrb[12].mxu1 %vm2470_vm11, %v2442_v15 }
 0x277   : > { %3654 = vmatmul.mubr.msk.bf16.gmra.mrb[12].mxu0 %vm2470_vm11, %v2426_v59 }
 0x28d   : > { %v3659_v38 = vpop.f32.mrb[0].mxu1 }
 0x28e   : > { %v3643_v61 = vpop.f32.mrb[0].mxu0  ;;  %v2614_v1 = vadd.f32 %v3659_v38, %v5448_v47  ;;  %v2605_v13 = vpop.f32.mrb[1].mxu1 }
 0x28f   : > { %v2550_v42 = vadd.f32 %v3643_v61, %v5448_v47  ;;  %v2541_v9 = vpop.f32.mrb[1].mxu0  ;;  %v5453_v14 = vadd.f32 %v5448_v47, %v2605_v13  ;;  %v3660_v39 = vpop.f32.mrb[2].mxu1 }
 0x290   : > { %v3594_v4 = vmul.f32 -1.442695, %v2614_v1  ;;  %v2542_v56 = vadd.f32 %v5448_v47, %v2541_v9  ;;  %v3644_v3 = vpop.f32.mrb[2].mxu0  ;;  %v5457_v37 = vadd.f32 %v3660_v39, %v5448_v47  ;;  %v2608_v60 = vpop.f32.mrb[3].mxu1 }
 0x291   : > { %v3578_v48 = vmul.f32 -1.442695, %v2550_v42  ;;  %v3592_v11 = vmul.f32 -1.442695, %v5453_v14  ;;  %v2553_v27 = vadd.f32 %v3644_v3, %v5448_v47  ;;  %v2544_v20 = vpop.f32.mrb[3].mxu0  ;;  %v5462_v30 = vadd.f32 %v5448_v47, %v2608_v60 }
 0x292   : > { %3953 = vpow2.f32 %v3594_v4  ;;  %v3576_v12 = vmul.f32 -1.442695, %v2542_v56  ;;  %v2545_v33 = vadd.f32 %v5448_v47, %v2544_v20  ;;  %v3595_v55 = vmul.f32 -1.442695, %v5457_v37 }
 0x293   : > { %3955 = vpow2.f32 %v3578_v48  ;;  %v3579_v54 = vmul.f32 -1.442695, %v2553_v27  ;;  %v3593_v35 = vmul.f32 -1.442695, %v5462_v30 }
 0x294   : > { %3957 = vpow2.f32 %v3576_v12  ;;  %v3577_v32 = vmul.f32 -1.442695, %v2545_v33 }
 0x295   : > { %3959 = vpow2.f32 %v3592_v11 }
 0x296   : > { %3961 = vpow2.f32 %v3579_v54 }
 0x297   : > { %3963 = vpow2.f32 %v3595_v55 }
 0x298   : > { %3965 = vpow2.f32 %v3577_v32 }
 0x299   : > { %3967 = vpow2.f32 %v3593_v35 }
 0x29c   : > { %v3954_v51 = vpop.eup %3953 }
 0x29d   : > { %v3956_v2 = vpop.eup %3955  ;;  %v2782_v62 = vadd.f32 1.0, %v3954_v51 }
 0x29e   : > { %v3958_v41 = vpop.eup %3957  ;;  %v2766_v7 = vadd.f32 1.0, %v3956_v2 }
 0x29f   : > { %v3960_v19 = vpop.eup %3959  ;;  %3969 = vrcp.f32 %v2782_v62  ;;  %v2764_v53 = vadd.f32 1.0, %v3958_v41 }
 0x2a0   : > { %v3962_v34 = vpop.eup %3961  ;;  %3971 = vrcp.f32 %v2766_v7  ;;  %v2780_v16 = vadd.f32 1.0, %v3960_v19 }
 0x2a1   : > { %v3964_v17 = vpop.eup %3963  ;;  %3973 = vrcp.f32 %v2764_v53  ;;  %v2767_v44 = vadd.f32 1.0, %v3962_v34 }
 0x2a2   : > { %v3966_v23 = vpop.eup %3965  ;;  %3975 = vrcp.f32 %v2780_v16  ;;  %v2783_v49 = vadd.f32 1.0, %v3964_v17 }
 0x2a3   : > { %v3968_v26 = vpop.eup %3967  ;;  %3977 = vrcp.f32 %v2767_v44  ;;  %v2765_v31 = vadd.f32 1.0, %v3966_v23 }
 0x2a4   : > { %3979 = vrcp.f32 %v2783_v49  ;;  %v2781_v28 = vadd.f32 1.0, %v3968_v26 }
 0x2a5   : > { %3981 = vrcp.f32 %v2765_v31 }
 0x2a6   : > { %3983 = vrcp.f32 %v2781_v28 }
 0x2a9   : > { %v3970_v25 = vpop.eup %3969 }
 0x2aa   : > { %v3972_v58 = vpop.eup %3971  ;;  %v2878_v52 = vmul.f32 %v3970_v25, %v2614_v1 }
 0x2ab   : > { %v3974_v57 = vpop.eup %3973  ;;  %v2862_v6 = vmul.f32 %v3972_v58, %v2550_v42 }
 0x2ac   : > { %v3976_v63 = vpop.eup %3975  ;;  %2910 = vst [vmem:[%s5468_s17 + $0x90] sm:$0xff] %v2878_v52  ;;  %v2860_v40 = vmul.f32 %v3974_v57, %v2542_v56 }
 0x2ad   : > { %v3978_v22 = vpop.eup %3977  ;;  %2894 = vst [vmem:[%s5468_s17 + $0x10] sm:$0xff] %v2862_v6  ;;  %v2876_v29 = vmul.f32 %v3976_v63, %v5453_v14 }
 0x2ae   : > { %v3980_v21 = vpop.eup %3979  ;;  %2892 = vst [vmem:[%s5468_s17] sm:$0xff] %v2860_v40  ;;  %v2863_v5 = vmul.f32 %v3978_v22, %v2553_v27 }
 0x2af   : > { %v3982_v10 = vpop.eup %3981  ;;  %2908 = vst [vmem:[%s5468_s17 + $0x80] sm:$0xff] %v2876_v29  ;;  %v2879_v43 = vmul.f32 %v3980_v21, %v5457_v37 }
 0x2b0   : > { %v3984_v0 = vpop.eup %3983  ;;  %2895 = vst [vmem:[%s5468_s17 + $0x18] sm:$0xff] %v2863_v5  ;;  %v2861_v50 = vmul.f32 %v3982_v10, %v2545_v33 }
 0x2b1   : > { %2911 = vst [vmem:[%s5468_s17 + $0x98] sm:$0xff] %v2879_v43  ;;  %v2877_v36 = vmul.f32 %v3984_v0, %v5462_v30 }
 0x2b2   : > { %2893 = vst [vmem:[%s5468_s17 + $0x8] sm:$0xff] %v2861_v50 }
 0x2b3   : > { %2909 = vst [vmem:[%s5468_s17 + $0x88] sm:$0xff] %v2877_v36 }
 0x2cd   : > { %v3663_v45 = vpop.f32.mrb[4].mxu1 }
 0x2ce   : > { %v3647_v46 = vpop.f32.mrb[4].mxu0  ;;  %v2630_v8 = vadd.f32 %v3663_v45, %v5448_v47  ;;  %v2621_v24 = vpop.f32.mrb[5].mxu1 }
 0x2cf   : > { %v2566_v15 = vadd.f32 %v3647_v46, %v5448_v47  ;;  %v2557_v18 = vpop.f32.mrb[5].mxu0  ;;  %v2622_v59 = vadd.f32 %v5448_v47, %v2621_v24  ;;  %v3664_v38 = vpop.f32.mrb[6].mxu1 }
 0x2d0   : > { %v3598_v61 = vmul.f32 -1.442695, %v2630_v8  ;;  %v2558_v1 = vadd.f32 %v5448_v47, %v2557_v18  ;;  %v3648_v13 = vpop.f32.mrb[6].mxu0  ;;  %v2633_v42 = vadd.f32 %v3664_v38, %v5448_v47  ;;  %v2624_v9 = vpop.f32.mrb[7].mxu1 }
 0x2d1   : > { %v3582_v14 = vmul.f32 -1.442695, %v2566_v15  ;;  %v3596_v39 = vmul.f32 -1.442695, %v2622_v59  ;;  %v2569_v4 = vadd.f32 %v3648_v13, %v5448_v47  ;;  %v2560_v56 = vpop.f32.mrb[7].mxu0  ;;  %v2625_v3 = vadd.f32 %v5448_v47, %v2624_v9 }
 0x2d2   : > { %3985 = vpow2.f32 %v3598_v61  ;;  %v3580_v37 = vmul.f32 -1.442695, %v2558_v1  ;;  %v2561_v60 = vadd.f32 %v5448_v47, %v2560_v56  ;;  %v3599_v11 = vmul.f32 -1.442695, %v2633_v42 }
 0x2d3   : > { %3987 = vpow2.f32 %v3582_v14  ;;  %v3583_v48 = vmul.f32 -1.442695, %v2569_v4  ;;  %v3597_v20 = vmul.f32 -1.442695, %v2625_v3 }
 0x2d4   : > { %3989 = vpow2.f32 %v3580_v37  ;;  %v3581_v27 = vmul.f32 -1.442695, %v2561_v60 }
 0x2d5   : > { %3991 = vpow2.f32 %v3596_v39 }
 0x2d6   : > { %3993 = vpow2.f32 %v3583_v48 }
 0x2d7   : > { %3995 = vpow2.f32 %v3599_v11 }
 0x2d8   : > { %3997 = vpow2.f32 %v3581_v27 }
 0x2d9   : > { %3999 = vpow2.f32 %v3597_v20 }
 0x2dc   : > { %v3986_v30 = vpop.eup %3985 }
 0x2dd   : > { %v3988_v12 = vpop.eup %3987  ;;  %v2786_v33 = vadd.f32 1.0, %v3986_v30 }
 0x2de   : > { %v3990_v54 = vpop.eup %3989  ;;  %v2770_v55 = vadd.f32 1.0, %v3988_v12 }
 0x2df   : > { %v3992_v32 = vpop.eup %3991  ;;  %4001 = vrcp.f32 %v2786_v33  ;;  %v2768_v35 = vadd.f32 1.0, %v3990_v54 }
 0x2e0   : > { %v3994_v51 = vpop.eup %3993  ;;  %4003 = vrcp.f32 %v2770_v55  ;;  %v2784_v2 = vadd.f32 1.0, %v3992_v32 }
 0x2e1   : > { %v3996_v62 = vpop.eup %3995  ;;  %4005 = vrcp.f32 %v2768_v35  ;;  %v2771_v41 = vadd.f32 1.0, %v3994_v51 }
 0x2e2   : > { %v3998_v7 = vpop.eup %3997  ;;  %4007 = vrcp.f32 %v2784_v2  ;;  %v2787_v19 = vadd.f32 1.0, %v3996_v62 }
 0x2e3   : > { %v4000_v53 = vpop.eup %3999  ;;  %4009 = vrcp.f32 %v2771_v41  ;;  %v2769_v34 = vadd.f32 1.0, %v3998_v7 }
 0x2e4   : > { %4011 = vrcp.f32 %v2787_v19  ;;  %v2785_v16 = vadd.f32 1.0, %v4000_v53 }
 0x2e5   : > { %4013 = vrcp.f32 %v2769_v34 }
 0x2e6   : > { %4015 = vrcp.f32 %v2785_v16 }
 0x2e9   : > { %v4002_v17 = vpop.eup %4001 }
 0x2ea   : > { %v4004_v44 = vpop.eup %4003  ;;  %v2882_v23 = vmul.f32 %v4002_v17, %v2630_v8 }
 0x2eb   : > { %v4006_v49 = vpop.eup %4005  ;;  %v2866_v26 = vmul.f32 %v4004_v44, %v2566_v15 }
 0x2ec   : > { %v4008_v31 = vpop.eup %4007  ;;  %2914 = vst [vmem:[%s5468_s17 + $0xb0] sm:$0xff] %v2882_v23  ;;  %v2864_v28 = vmul.f32 %v4006_v49, %v2558_v1 }
 0x2ed   : > { %v4010_v25 = vpop.eup %4009  ;;  %2898 = vst [vmem:[%s5468_s17 + $0x30] sm:$0xff] %v2866_v26  ;;  %v2880_v58 = vmul.f32 %v4008_v31, %v2622_v59 }
 0x2ee   : > { %v4012_v52 = vpop.eup %4011  ;;  %2896 = vst [vmem:[%s5468_s17 + $0x20] sm:$0xff] %v2864_v28  ;;  %v2867_v57 = vmul.f32 %v4010_v25, %v2569_v4 }
 0x2ef   : > { %v4014_v6 = vpop.eup %4013  ;;  %2912 = vst [vmem:[%s5468_s17 + $0xa0] sm:$0xff] %v2880_v58  ;;  %v2883_v63 = vmul.f32 %v4012_v52, %v2633_v42 }
 0x2f0   : > { %v4016_v40 = vpop.eup %4015  ;;  %2899 = vst [vmem:[%s5468_s17 + $0x38] sm:$0xff] %v2867_v57  ;;  %v2865_v22 = vmul.f32 %v4014_v6, %v2561_v60 }
 0x2f1   : > { %2915 = vst [vmem:[%s5468_s17 + $0xb8] sm:$0xff] %v2883_v63  ;;  %v2881_v29 = vmul.f32 %v4016_v40, %v2625_v3 }
 0x2f2   : > { %2897 = vst [vmem:[%s5468_s17 + $0x28] sm:$0xff] %v2865_v22 }
 0x2f3   : > { %2913 = vst [vmem:[%s5468_s17 + $0xa8] sm:$0xff] %v2881_v29 }
 0x30d   : > { %v3667_v21 = vpop.f32.mrb[8].mxu1 }
 0x30e   : > { %v3651_v5 = vpop.f32.mrb[8].mxu0  ;;  %v2646_v10 = vadd.f32 %v3667_v21, %v5448_v47  ;;  %v2637_v43 = vpop.f32.mrb[9].mxu1 }
 0x30f   : > { %v2582_v0 = vadd.f32 %v3651_v5, %v5448_v47  ;;  %v2573_v50 = vpop.f32.mrb[9].mxu0  ;;  %v2638_v36 = vadd.f32 %v5448_v47, %v2637_v43  ;;  %v3668_v45 = vpop.f32.mrb[10].mxu1 }
 0x310   : > { %v3602_v46 = vmul.f32 -1.442695, %v2646_v10  ;;  %v2574_v8 = vadd.f32 %v5448_v47, %v2573_v50  ;;  %v3652_v24 = vpop.f32.mrb[10].mxu0  ;;  %v2649_v15 = vadd.f32 %v3668_v45, %v5448_v47  ;;  %v2640_v18 = vpop.f32.mrb[11].mxu1 }
 0x311   : > { %v3586_v59 = vmul.f32 -1.442695, %v2582_v0  ;;  %v3600_v38 = vmul.f32 -1.442695, %v2638_v36  ;;  %v2585_v61 = vadd.f32 %v3652_v24, %v5448_v47  ;;  %v2576_v1 = vpop.f32.mrb[11].mxu0  ;;  %v2641_v13 = vadd.f32 %v5448_v47, %v2640_v18 }
 0x312   : > { %4017 = vpow2.f32 %v3602_v46  ;;  %v3584_v42 = vmul.f32 -1.442695, %v2574_v8  ;;  %v2577_v9 = vadd.f32 %v5448_v47, %v2576_v1  ;;  %v3603_v39 = vmul.f32 -1.442695, %v2649_v15 }
 0x313   : > { %4019 = vpow2.f32 %v3586_v59  ;;  %v3587_v14 = vmul.f32 -1.442695, %v2585_v61  ;;  %v3601_v56 = vmul.f32 -1.442695, %v2641_v13 }
 0x314   : > { %4021 = vpow2.f32 %v3584_v42  ;;  %v3585_v4 = vmul.f32 -1.442695, %v2577_v9 }
 0x315   : > { %4023 = vpow2.f32 %v3600_v38 }
 0x316   : > { %4025 = vpow2.f32 %v3587_v14 }
 0x317   : > { %4027 = vpow2.f32 %v3603_v39 }
 0x318   : > { %4029 = vpow2.f32 %v3585_v4 }
 0x319   : > { %4031 = vpow2.f32 %v3601_v56 }
 0x31c   : > { %v4018_v3 = vpop.eup %4017 }
 0x31d   : > { %v4020_v37 = vpop.eup %4019  ;;  %v2790_v60 = vadd.f32 1.0, %v4018_v3 }
 0x31e   : > { %v4022_v48 = vpop.eup %4021  ;;  %v2774_v11 = vadd.f32 1.0, %v4020_v37 }
 0x31f   : > { %v4024_v27 = vpop.eup %4023  ;;  %4033 = vrcp.f32 %v2790_v60  ;;  %v2772_v20 = vadd.f32 1.0, %v4022_v48 }
 0x320   : > { %v4026_v30 = vpop.eup %4025  ;;  %4035 = vrcp.f32 %v2774_v11  ;;  %v2788_v12 = vadd.f32 1.0, %v4024_v27 }
 0x321   : > { %v4028_v33 = vpop.eup %4027  ;;  %4037 = vrcp.f32 %v2772_v20  ;;  %v2775_v54 = vadd.f32 1.0, %v4026_v30 }
 0x322   : > { %v4030_v55 = vpop.eup %4029  ;;  %4039 = vrcp.f32 %v2788_v12  ;;  %v2791_v32 = vadd.f32 1.0, %v4028_v33 }
 0x323   : > { %v4032_v35 = vpop.eup %4031  ;;  %4041 = vrcp.f32 %v2775_v54  ;;  %v2773_v51 = vadd.f32 1.0, %v4030_v55 }
 0x324   : > { %4043 = vrcp.f32 %v2791_v32  ;;  %v2789_v2 = vadd.f32 1.0, %v4032_v35 }
 0x325   : > { %4045 = vrcp.f32 %v2773_v51 }
 0x326   : > { %4047 = vrcp.f32 %v2789_v2 }
 0x329   : > { %v4034_v62 = vpop.eup %4033 }
 0x32a   : > { %v4036_v41 = vpop.eup %4035  ;;  %v2886_v7 = vmul.f32 %v4034_v62, %v2646_v10 }
 0x32b   : > { %v4038_v19 = vpop.eup %4037  ;;  %v2870_v53 = vmul.f32 %v4036_v41, %v2582_v0 }
 0x32c   : > { %v4040_v34 = vpop.eup %4039  ;;  %2918 = vst [vmem:[%s5468_s17 + $0xd0] sm:$0xff] %v2886_v7  ;;  %v2868_v16 = vmul.f32 %v4038_v19, %v2574_v8 }
 0x32d   : > { %v4042_v17 = vpop.eup %4041  ;;  %2902 = vst [vmem:[%s5468_s17 + $0x50] sm:$0xff] %v2870_v53  ;;  %v2884_v44 = vmul.f32 %v4040_v34, %v2638_v36 }
 0x32e   : > { %v4044_v23 = vpop.eup %4043  ;;  %2900 = vst [vmem:[%s5468_s17 + $0x40] sm:$0xff] %v2868_v16  ;;  %v2871_v49 = vmul.f32 %v4042_v17, %v2585_v61 }
 0x32f   : > { %v4046_v26 = vpop.eup %4045  ;;  %2916 = vst [vmem:[%s5468_s17 + $0xc0] sm:$0xff] %v2884_v44  ;;  %v2887_v31 = vmul.f32 %v4044_v23, %v2649_v15  ;;  %v3028_v44 = vld [vmem:[%s5468_s17] sm:$0xff] (%p4640_p11)  ;;  %v3030_v23 = vld [vmem:[%s5468_s17 + $0x8] sm:$0xff] (%p4640_p11) }
 0x330   : > { %v4048_v28 = vpop.eup %4047  ;;  %2903 = vst [vmem:[%s5468_s17 + $0x58] sm:$0xff] %v2871_v49  ;;  %v2869_v25 = vmul.f32 %v4046_v26, %v2577_v9  ;;  %v3032_v49 = vld [vmem:[%s5468_s17 + $0x10] sm:$0xff] (%p4640_p11)  ;;  %v3034_v26 = vld [vmem:[%s5468_s17 + $0x18] sm:$0xff] (%p4640_p11)  ;;  %3029 = vst [vmem:[%s5538_s23] sm:$0xff] (%p4640_p11), %v3028_v44 }
 0x331   : > { %2919 = vst [vmem:[%s5468_s17 + $0xd8] sm:$0xff] %v2887_v31  ;;  %v2885_v58 = vmul.f32 %v4048_v28, %v2641_v13  ;;  %v3036_v31 = vld [vmem:[%s5468_s17 + $0x20] sm:$0xff] (%p4640_p11)  ;;  %v3038_v28 = vld [vmem:[%s5468_s17 + $0x28] sm:$0xff] (%p4640_p11)  ;;  %3031 = vst [vmem:[%s5538_s23 + $0x8] sm:$0xff] (%p4640_p11), %v3030_v23 }
 0x332   : > { %2901 = vst [vmem:[%s5468_s17 + $0x48] sm:$0xff] %v2869_v25  ;;  %3033 = vst [vmem:[%s5538_s23 + $0x10] sm:$0xff] (%p4640_p11), %v3032_v49  ;;  %v3040_v25 = vld [vmem:[%s5468_s17 + $0x30] sm:$0xff] (%p4640_p11) }
 0x333   : > { %2917 = vst [vmem:[%s5468_s17 + $0xc8] sm:$0xff] %v2885_v58  ;;  %3035 = vst [vmem:[%s5538_s23 + $0x18] sm:$0xff] (%p4640_p11), %v3034_v26  ;;  %v3042_v58 = vld [vmem:[%s5468_s17 + $0x38] sm:$0xff] (%p4640_p11) }
 0x334   : > { %3037 = vst [vmem:[%s5538_s23 + $0x20] sm:$0xff] (%p4640_p11), %v3036_v31  ;;  %3039 = vst [vmem:[%s5538_s23 + $0x28] sm:$0xff] (%p4640_p11), %v3038_v28 }
 0x335   : > { %3041 = vst [vmem:[%s5538_s23 + $0x30] sm:$0xff] (%p4640_p11), %v3040_v25  ;;  %3043 = vst [vmem:[%s5538_s23 + $0x38] sm:$0xff] (%p4640_p11), %v3042_v58 }
 0x349   : > { %v3671_v52 = vpop.f32.mrb[12].mxu1 }
 0x34a   : > { %v3655_v57 = vpop.f32.mrb[12].mxu0  ;;  %v2662_v6 = vadd.f32 %v3671_v52, %v5448_v47  ;;  %v2653_v63 = vpop.f32.mrb[13].mxu1  ;;  %v3044_v52 = vld [vmem:[%s5468_s17 + $0x40] sm:$0xff] (%p4640_p11) }
 0x34b   : > { %v2598_v40 = vadd.f32 %v3655_v57, %v5448_v47  ;;  %v2589_v22 = vpop.f32.mrb[13].mxu0  ;;  %v2654_v29 = vadd.f32 %v5448_v47, %v2653_v63  ;;  %v3672_v21 = vpop.f32.mrb[14].mxu1  ;;  %3045 = vst [vmem:[%s5538_s23 + $0x40] sm:$0xff] (%p4640_p11), %v3044_v52  ;;  %v3046_v57 = vld [vmem:[%s5468_s17 + $0x48] sm:$0xff] (%p4640_p11)  ;;  %v3050_v63 = vld [vmem:[%s5468_s17 + $0x58] sm:$0xff] (%p4640_p11) }
 0x34c   : > { %v3606_v5 = vmul.f32 -1.442695, %v2662_v6  ;;  %v2590_v10 = vadd.f32 %v5448_v47, %v2589_v22  ;;  %v3656_v43 = vpop.f32.mrb[14].mxu0  ;;  %v2665_v0 = vadd.f32 %v3672_v21, %v5448_v47  ;;  %v2656_v50 = vpop.f32.mrb[15].mxu1  ;;  %3047 = vst [vmem:[%s5538_s23 + $0x48] sm:$0xff] (%p4640_p11), %v3046_v57  ;;  %3051 = vst [vmem:[%s5538_s23 + $0x58] sm:$0xff] (%p4640_p11), %v3050_v63 }
 0x34d   : > { %v3590_v36 = vmul.f32 -1.442695, %v2598_v40  ;;  %v3604_v45 = vmul.f32 -1.442695, %v2654_v29  ;;  %v2601_v46 = vadd.f32 %v3656_v43, %v5448_v47  ;;  %v2592_v8 = vpop.f32.mrb[15].mxu0  ;;  %v2657_v24 = vadd.f32 %v5448_v47, %v2656_v50  ;;  %v3064_v43 = vld [vmem:[%s5468_s17 + $0x90] sm:$0xff] (%p4640_p11) }
 0x34e   : > { %4049 = vpow2.f32 %v3606_v5  ;;  %v3588_v15 = vmul.f32 -1.442695, %v2590_v10  ;;  %v2593_v18 = vadd.f32 %v5448_v47, %v2592_v8  ;;  %v3607_v38 = vmul.f32 -1.442695, %v2665_v0  ;;  %v3060_v5 = vld [vmem:[%s5468_s17 + $0x80] sm:$0xff] (%p4640_p11)  ;;  %3065 = vst [vmem:[%s5538_s23 + $0x110] sm:$0xff] (%p4640_p11), %v3064_v43 }
 0x34f   : > { %4051 = vpow2.f32 %v3590_v36  ;;  %v3591_v59 = vmul.f32 -1.442695, %v2601_v46  ;;  %v3605_v1 = vmul.f32 -1.442695, %v2657_v24  ;;  %3061 = vst [vmem:[%s5538_s23 + $0x100] sm:$0xff] (%p4640_p11), %v3060_v5  ;;  %v3068_v50 = vld [vmem:[%s5468_s17 + $0xa0] sm:$0xff] (%p4640_p11) }
 0x350   : > { %4053 = vpow2.f32 %v3588_v15  ;;  %v3589_v61 = vmul.f32 -1.442695, %v2593_v18  ;;  %3069 = vst [vmem:[%s5538_s23 + $0x120] sm:$0xff] (%p4640_p11), %v3068_v50  ;;  %v3070_v36 = vld [vmem:[%s5468_s17 + $0xa8] sm:$0xff] (%p4640_p11)  ;;  %v3076_v8 = vld [vmem:[%s5468_s17 + $0xc0] sm:$0xff] (%p4640_p11)  ;;  %v3080_v15 = vld [vmem:[%s5468_s17 + $0xd0] sm:$0xff] (%p4640_p11) }
 0x351   : > { %4055 = vpow2.f32 %v3604_v45  ;;  %v3072_v45 = vld [vmem:[%s5468_s17 + $0xb0] sm:$0xff] (%p4640_p11)  ;;  %3071 = vst [vmem:[%s5538_s23 + $0x128] sm:$0xff] (%p4640_p11), %v3070_v36  ;;  %3077 = vst [vmem:[%s5538_s23 + $0x140] sm:$0xff] (%p4640_p11), %v3076_v8 }
 0x352   : > { %4057 = vpow2.f32 %v3591_v59  ;;  %3073 = vst [vmem:[%s5538_s23 + $0x130] sm:$0xff] (%p4640_p11), %v3072_v45  ;;  %3081 = vst [vmem:[%s5538_s23 + $0x150] sm:$0xff] (%p4640_p11), %v3080_v15 }
 0x353   : > { %4059 = vpow2.f32 %v3607_v38 }
 0x354   : > { %4061 = vpow2.f32 %v3589_v61 }
 0x355   : > { %4063 = vpow2.f32 %v3605_v1 }
 0x358   : > { %v4050_v13 = vpop.eup %4049 }
 0x359   : > { %v4052_v42 = vpop.eup %4051  ;;  %v2794_v9 = vadd.f32 1.0, %v4050_v13 }
 0x35a   : > { %v4054_v14 = vpop.eup %4053  ;;  %v2778_v39 = vadd.f32 1.0, %v4052_v42 }
 0x35b   : > { %v4056_v4 = vpop.eup %4055  ;;  %4065 = vrcp.f32 %v2794_v9  ;;  %v2776_v56 = vadd.f32 1.0, %v4054_v14 }
 0x35c   : > { %v4058_v47 = vpop.eup %4057  ;;  %4067 = vrcp.f32 %v2778_v39  ;;  %v2792_v3 = vadd.f32 1.0, %v4056_v4 }
 0x35d   : > { %v4060_v37 = vpop.eup %4059  ;;  %4069 = vrcp.f32 %v2776_v56  ;;  %v2779_v60 = vadd.f32 1.0, %v4058_v47 }
 0x35e   : > { %v4062_v48 = vpop.eup %4061  ;;  %4071 = vrcp.f32 %v2792_v3  ;;  %v2795_v11 = vadd.f32 1.0, %v4060_v37 }
 0x35f   : > { %v4064_v27 = vpop.eup %4063  ;;  %4073 = vrcp.f32 %v2779_v60  ;;  %v2777_v20 = vadd.f32 1.0, %v4062_v48 }
 0x360   : > { %4075 = vrcp.f32 %v2795_v11  ;;  %v2793_v30 = vadd.f32 1.0, %v4064_v27 }
 0x361   : > { %4077 = vrcp.f32 %v2777_v20 }
 0x362   : > { %4079 = vrcp.f32 %v2793_v30 }
 0x365   : > { %v4066_v12 = vpop.eup %4065 }
 0x366   : > { %v4068_v33 = vpop.eup %4067  ;;  %v2890_v54 = vmul.f32 %v4066_v12, %v2662_v6  ;;  %v3048_v6 = vld [vmem:[%s5468_s17 + $0x50] sm:$0xff] (%p4640_p11) }
 0x367   : > { %v4070_v55 = vpop.eup %4069  ;;  %v2874_v32 = vmul.f32 %v4068_v33, %v2598_v40  ;;  %3049 = vst [vmem:[%s5538_s23 + $0x50] sm:$0xff] (%p4640_p11), %v3048_v6 }
 0x368   : > { %v4072_v35 = vpop.eup %4071  ;;  %2922 = vst [vmem:[%s5468_s17 + $0xf0] sm:$0xff] %v2890_v54  ;;  %v2872_v51 = vmul.f32 %v4070_v55, %v2590_v10  ;;  %v3062_v10 = vld [vmem:[%s5468_s17 + $0x88] sm:$0xff] (%p4640_p11) }
 0x369   : > { %v4074_v2 = vpop.eup %4073  ;;  %2906 = vst [vmem:[%s5468_s17 + $0x70] sm:$0xff] %v2874_v32  ;;  %v2888_v62 = vmul.f32 %v4072_v35, %v2654_v29  ;;  %2930 = sbr.rel (!%p4640_p11) target bundleno = 888 (0x378), region = 482  ;;  %3063 = vst [vmem:[%s5538_s23 + $0x108] sm:$0xff] (%p4640_p11), %v3062_v10 }
 0x36a   : > { %v4076_v41 = vpop.eup %4075  ;;  %2904 = vst [vmem:[%s5468_s17 + $0x60] sm:$0xff] %v2872_v51  ;;  %v2875_v7 = vmul.f32 %v4074_v2, %v2601_v46  ;;  %v3074_v46 = vld [vmem:[%s5468_s17 + $0xb8] sm:$0xff] (%p4640_p11) }
 0x36b   : > { %v4078_v19 = vpop.eup %4077  ;;  %2920 = vst [vmem:[%s5468_s17 + $0xe0] sm:$0xff] %v2888_v62  ;;  %v2891_v53 = vmul.f32 %v4076_v41, %v2665_v0  ;;  %v3066_v0 = vld [vmem:[%s5468_s17 + $0x98] sm:$0xff] (%p4640_p11)  ;;  %3075 = vst [vmem:[%s5538_s23 + $0x138] sm:$0xff] (%p4640_p11), %v3074_v46 }
 0x36c   : > { %v4080_v34 = vpop.eup %4079  ;;  %2907 = vst [vmem:[%s5468_s17 + $0x78] sm:$0xff] %v2875_v7  ;;  %v2873_v16 = vmul.f32 %v4078_v19, %v2593_v18  ;;  %3067 = vst [vmem:[%s5538_s23 + $0x118] sm:$0xff] (%p4640_p11), %v3066_v0  ;;  %v3082_v18 = vld [vmem:[%s5468_s17 + $0xd8] sm:$0xff] (%p4640_p11) }
 0x36d   : > { %2923 = vst [vmem:[%s5468_s17 + $0xf8] sm:$0xff] %v2891_v53  ;;  %v2889_v17 = vmul.f32 %v4080_v34, %v2657_v24  ;;  %v3078_v24 = vld [vmem:[%s5468_s17 + $0xc8] sm:$0xff] (%p4640_p11)  ;;  %3083 = vst [vmem:[%s5538_s23 + $0x158] sm:$0xff] (%p4640_p11), %v3082_v18 }
 0x36e   : > { %2905 = vst [vmem:[%s5468_s17 + $0x68] sm:$0xff] %v2873_v16  ;;  %3079 = vst [vmem:[%s5538_s23 + $0x148] sm:$0xff] (%p4640_p11), %v3078_v24 }
 0x36f   : > { %2921 = vst [vmem:[%s5468_s17 + $0xe8] sm:$0xff] %v2889_v17  ;;  %v3088_v61 = vld [vmem:[%s5468_s17 + $0xf0] sm:$0xff] (%p4640_p11) }
 0x370   : > { %v3056_v29 = vld [vmem:[%s5468_s17 + $0x70] sm:$0xff]  ;;  %3089 = vst [vmem:[%s5538_s23 + $0x170] sm:$0xff] %v3088_v61 }
 0x371   : > { %v3052_v40 = vld [vmem:[%s5468_s17 + $0x60] sm:$0xff]  ;;  %3057 = vst [vmem:[%s5538_s23 + $0x70] sm:$0xff] %v3056_v29 }
 0x372   : > { %3053 = vst [vmem:[%s5538_s23 + $0x60] sm:$0xff] %v3052_v40  ;;  %v3084_v59 = vld [vmem:[%s5468_s17 + $0xe0] sm:$0xff] }
 0x373   : > { %v3058_v21 = vld [vmem:[%s5468_s17 + $0x78] sm:$0xff]  ;;  %3085 = vst [vmem:[%s5538_s23 + $0x160] sm:$0xff] %v3084_v59 }
 0x374   : > { %3059 = vst [vmem:[%s5538_s23 + $0x78] sm:$0xff] %v3058_v21  ;;  %v3090_v1 = vld [vmem:[%s5468_s17 + $0xf8] sm:$0xff] }
 0x375   : > { %v3054_v22 = vld [vmem:[%s5468_s17 + $0x68] sm:$0xff]  ;;  %3091 = vst [vmem:[%s5538_s23 + $0x178] sm:$0xff] %v3090_v1 }
 0x376   : > { %3055 = vst [vmem:[%s5538_s23 + $0x68] sm:$0xff] %v3054_v22  ;;  %v3086_v38 = vld [vmem:[%s5468_s17 + $0xe8] sm:$0xff] }
 0x377   : > { %3087 = vst [vmem:[%s5538_s23 + $0x168] sm:$0xff] %v3086_v38 }
 0x378 PF: > { %s22_s6 = sadd.s32 1, %s4279_s6   ;;  %s5821_s21 = sld [smem:[#allocation14_spill]] }
 0x379   : > { %p5602_p12 = scmp.ge.s32.totalorder %s22_s6, 4   ;;  %s5822_s27 = sld [smem:[#allocation18_spill]] }
 0x37a   : > { %s5823_s28 = sld [smem:[#allocation40_spill]]  ;;  %s5824_s29 = sld [smem:[#allocation20_spill]] }
 0x37b   : > { %s5825_s30 = sld [smem:[#allocation38_spill]]  ;;  %s5826_s13 = sld [smem:[#allocation22_spill]] }
 0x37c   : > { %s5827_s19 = sld [smem:[#allocation37_spill]]  ;;  %s5828_s7 = sld [smem:[#allocation36_spill]] }
 0x37d   : > { %s5829_s0 = sld [smem:[#allocation35_spill]]  ;;  %s5830_s22 = smov %s5855_s8 }
 0x37e   : > { %s5831_s1 = sld [smem:[#allocation34_spill]]  ;;  %s5832_s23 = smov %s4195_s24 }
 0x37f   : > { %s5833_s24 = smov %s4624_s15  ;;  %s5834_s10 = sld [smem:[#allocation33_spill]] }
 0x380   : > { %s5835_s25 = smov %s4203_s26  ;;  %s5836_s26 = smov %s4610_s14 }
 0x381   : > { %s5837_s2 = sld [smem:[#allocation32_spill]]  ;;  %s5838_s8 = sld [smem:[#allocation29_spill]] }
 0x382   : > { %s5839_s3 = sld [smem:[#allocation30_spill]]  ;;  %s5840_s14 = smov %s5827_s19 }
 0x383   : > { %s5841_s15 = smov %s4235_s16  ;;  %s5842_s16 = smov %s5828_s7 }
 0x384   : > { %s5843_s17 = smov %s4243_s18  ;;  %s5844_s18 = smov %s5829_s0 }
 0x385   : > { %s5845_s19 = smov %s4251_s20  ;;  %s5846_s20 = smov %s5831_s1 }
 0x386   : > { %s5847_s12 = smov %s4259_s11  ;;  %s5848_s11 = smov %s5834_s10 }
 0x387   : > { %s5849_s10 = smov %s4267_s9  ;;  %s5850_s9 = smov %s5837_s2 }
 0x388   : > { %s5851_s7 = smov %s5839_s3  ;;  %21 = sbr.rel (!%p5602_p12) target bundleno = 27 (0x1b), region = 629 }

</bundles_post_ra>
